<compile_context>
chip_gen: v5e
topology: v5e:2x2
jax: 0.10.0
libtpu: 0.0.40
codegen_flags: <defaults>
</compile_context>

<pallas_src>
import functools

import jax
import jax.numpy as jnp
from jax.experimental import pallas as pl
from jax.experimental.pallas import tpu as pltpu


def _attention_kernel(x_ref, wqkv_ref, wo_ref, bo_ref, y_ref, *, heads, dim_head):
    """Fused multi-head attention for one batch image (grid = (B,)).

    x_ref    : (1, N, C)        pixels x channels for this batch element
    wqkv_ref : (C, 3*hidden)    fused QKV 1x1-conv weight (Q cols pre-scaled)
    wo_ref   : (hidden, C)      out 1x1-conv weight
    bo_ref   : (1, C)           out 1x1-conv bias
    y_ref    : (1, N, C)        output
    """
    hidden = heads * dim_head

    x = x_ref[0]                                                            # (N, C)

    # Single lane-dense QKV projection: (N, C) @ (C, 3*hidden) -> (N, 3*hidden)
    qkv = jnp.dot(x, wqkv_ref[...], preferred_element_type=jnp.float32)

    # Per-head attention; heads is a small static count -> unrolled Python loop.
    outs = []
    for h in range(heads):
        lo = h * dim_head
        hi = lo + dim_head
        q = qkv[:, lo:hi]                               # (N, dh), already * scale
        k = qkv[:, hidden + lo:hidden + hi]             # (N, dh)
        v = qkv[:, 2 * hidden + lo:2 * hidden + hi]     # (N, dh)

        # sim[i, j] = sum_d q[i, d] * k[j, d]  (== einsum 'bhdi,bhdj->bhij')
        sim = jnp.dot(q, k.T, preferred_element_type=jnp.float32)           # (N, N)
        sim = sim - jnp.max(sim, axis=-1, keepdims=True)
        e = jnp.exp(sim)
        inv = pl.reciprocal(jnp.sum(e, axis=-1, keepdims=True), approx=True)
        attn = e * inv

        # out_h[i, d] = sum_j attn[i, j] * v[j, d]
        outs.append(jnp.dot(attn, v, preferred_element_type=jnp.float32))   # (N, dh)

    # Concatenate head outputs along lanes -> (N, hidden); channel layout
    # h*dim_head + d matches the PyTorch rearrange 'b h (x y) d -> b (h d) x y'.
    out_all = jnp.concatenate(outs, axis=-1)                                # (N, hidden)

    # Single K=hidden out-projection: (N, hidden) @ (hidden, C) -> (N, C)
    y = jnp.dot(out_all, wo_ref[...], preferred_element_type=jnp.float32)
    y_ref[0] = (y + bo_ref[...]).astype(y_ref.dtype)


def attention_pallas(x_nchw, w_qkv, w_out, b_out, *, heads, dim_head):
    B, C, H, W = x_nchw.shape
    N = H * W
    hidden = heads * dim_head
    scale = dim_head ** (-0.5)

    # NCHW -> (B, N, C): pixels on sublanes, channels on lanes.
    x = jnp.transpose(x_nchw.reshape(B, C, N), (0, 2, 1))

    # to_qkv conv weight (3*hidden, C, 1, 1) -> fused matmul weight (C, 3*hidden).
    # PyTorch chunk(3, dim=1): q = cols[0:hidden], k = next, v = last.
    # Fold the softmax scale into the Q columns (one-time wrapper op).
    w_fused = jnp.transpose(w_qkv.reshape(3 * hidden, C), (1, 0))           # (C, 3*hidden)
    w_fused = jnp.concatenate(
        [w_fused[:, :hidden] * scale, w_fused[:, hidden:]], axis=1)

    # to_out conv weight (C, hidden, 1, 1) -> (hidden, C); bias -> (1, C)
    wo = jnp.transpose(w_out.reshape(C, hidden), (1, 0))                    # (hidden, C)
    bo = b_out.reshape(1, C)

    kernel = functools.partial(_attention_kernel, heads=heads, dim_head=dim_head)

    y = pl.pallas_call(
        kernel,
        out_shape=jax.ShapeDtypeStruct((B, N, C), x.dtype),
        grid_spec=pltpu.PrefetchScalarGridSpec(
            num_scalar_prefetch=0,
            grid=(B,),
            in_specs=[
                pl.BlockSpec((1, N, C), lambda b: (b, 0, 0)),          # x (per batch)
                pl.BlockSpec((C, 3 * hidden), lambda b: (0, 0)),       # fused qkv W (resident)
                pl.BlockSpec((hidden, C), lambda b: (0, 0)),           # out W (resident)
                pl.BlockSpec((1, C), lambda b: (0, 0)),                # out bias (resident)
            ],
            out_specs=pl.BlockSpec((1, N, C), lambda b: (b, 0, 0)),
        ),
        compiler_params=pltpu.CompilerParams(
            dimension_semantics=("parallel",)),
    )(x, w_fused, wo, bo)

    # (B, N, C) -> NCHW
    return jnp.transpose(y, (0, 2, 1)).reshape(B, C, H, W)


def attention_ref(x, w_qkv, w_out, b_out, *, heads, dim_head):
    """Plain-JAX reference mirroring the PyTorch forward exactly."""
    B, C, H, W = x.shape
    hidden = heads * dim_head
    scale = dim_head ** (-0.5)
    qkv = jnp.einsum('bchw,oc->bohw', x, w_qkv.reshape(3 * hidden, C))
    q, k, v = jnp.split(qkv, 3, axis=1)
    rearr = lambda t: t.reshape(B, heads, dim_head, H * W)
    q, k, v = rearr(q), rearr(k), rearr(v)
    q = q * scale
    sim = jnp.einsum('bhdi,bhdj->bhij', q, k)
    sim = sim - jnp.max(sim, axis=-1, keepdims=True)
    attn = jax.nn.softmax(sim, axis=-1)
    out = jnp.einsum('bhij,bhdj->bhid', attn, v)
    out = out.transpose(0, 1, 3, 2).reshape(B, hidden, H, W)
    y = jnp.einsum('bchw,oc->bohw', out, w_out.reshape(C, hidden))
    return y + b_out.reshape(1, C, 1, 1)


if __name__ == "__main__":
    # Small shapes consistent with the module: dim=4, heads=4, dim_head=32.
    B, dim, H, W = 2, 4, 8, 8
    heads, dim_head = 4, 32
    hidden = heads * dim_head

    key = jax.random.PRNGKey(0)
    k_x, k_wqkv, k_wout, k_bout = jax.random.split(key, 4)

    x = jax.random.normal(k_x, (B, dim, H, W), dtype=jnp.float32)
    # Deterministic synthetic parameters (same shapes as nn.Conv2d weights).
    w_qkv = jax.random.normal(k_wqkv, (3 * hidden, dim, 1, 1), jnp.float32) * 0.1
    w_out = jax.random.normal(k_wout, (dim, hidden, 1, 1), jnp.float32) * 0.1
    b_out = jax.random.normal(k_bout, (dim,), jnp.float32) * 0.1

    y = attention_pallas(x, w_qkv, w_out, b_out, heads=heads, dim_head=dim_head)
    y = jax.block_until_ready(y)

    y_ref = attention_ref(x, w_qkv, w_out, b_out, heads=heads, dim_head=dim_head)
    assert y.shape == (B, dim, H, W)
    # Tolerance 1e-3 to accommodate the approximate (EUP) softmax reciprocal.
    assert jnp.allclose(y, y_ref, rtol=1e-3, atol=1e-3), "mismatch vs reference"

    print("KERNEL_OK")
</pallas_src>

<mosaic_0001>
module attributes {stable_mosaic.version = 11 : i64} {
  func.func @_attention_kernel(%arg0: i32, %arg1: memref<1x64x4xf32, #tpu.memory_space<vmem>>, %arg2: memref<4x384xf32, #tpu.memory_space<vmem>>, %arg3: memref<128x4xf32, #tpu.memory_space<vmem>>, %arg4: memref<1x4xf32, #tpu.memory_space<vmem>>, %arg5: memref<1x64x4xf32, #tpu.memory_space<vmem>>) attributes {dimension_semantics = [#tpu.dimension_semantics<parallel>], iteration_bounds = array<i64: 2>, scalar_prefetch = 0 : i64, scratch_operands = 0 : i64, tpu.core_type = #tpu.core_type<tc>, window_params = [{transform_indices = @transform_0, window_bounds = array<i64: 1, 64, 4>}, {pipeline_mode = #tpu.pipeline_mode<synchronous>, transform_indices = @transform_1, window_bounds = array<i64: 4, 384>}, {pipeline_mode = #tpu.pipeline_mode<synchronous>, transform_indices = @transform_2, window_bounds = array<i64: 128, 4>}, {pipeline_mode = #tpu.pipeline_mode<synchronous>, transform_indices = @transform_3, window_bounds = array<i64: 1, 4>}, {transform_indices = @transform_4, window_bounds = array<i64: 1, 64, 4>}]} {
    %c0 = arith.constant 0 : index
    %c0_0 = arith.constant 0 : index
    %c0_1 = arith.constant 0 : index
    %0 = vector.load %arg1[%c0, %c0_0, %c0_1] : memref<1x64x4xf32, #tpu.memory_space<vmem>>, vector<1x64x4xf32>
    %1 = vector.shape_cast %0 : vector<1x64x4xf32> to vector<64x4xf32>
    %c0_2 = arith.constant 0 : index
    %c0_3 = arith.constant 0 : index
    %2 = vector.load %arg2[%c0_2, %c0_3] : memref<4x384xf32, #tpu.memory_space<vmem>>, vector<4x384xf32>
    %cst = arith.constant dense<0.000000e+00> : vector<64x384xf32>
    %3 = tpu.matmul %1, %2, %cst {dimension_numbers = #tpu.dot_dimension_numbers<[1], [0], [0], [1], [0, 0, 1, 1], [], []>} : vector<64x4xf32>, vector<4x384xf32>, vector<64x384xf32> -> vector<64x384xf32>
    %4 = vector.extract_strided_slice %3 {offsets = [0, 0], sizes = [64, 32], strides = [1, 1]} : vector<64x384xf32> to vector<64x32xf32>
    %5 = vector.extract_strided_slice %3 {offsets = [0, 128], sizes = [64, 32], strides = [1, 1]} : vector<64x384xf32> to vector<64x32xf32>
    %6 = vector.extract_strided_slice %3 {offsets = [0, 256], sizes = [64, 32], strides = [1, 1]} : vector<64x384xf32> to vector<64x32xf32>
    %7 = tpu.transpose %5, [1, 0] : vector<64x32xf32> -> vector<32x64xf32>
    %cst_4 = arith.constant dense<0.000000e+00> : vector<64x64xf32>
    %8 = tpu.matmul %4, %7, %cst_4 {dimension_numbers = #tpu.dot_dimension_numbers<[1], [0], [0], [1], [0, 0, 1, 1], [], []>} : vector<64x32xf32>, vector<32x64xf32>, vector<64x64xf32> -> vector<64x64xf32>
    %cst_5 = arith.constant dense<0xFF800000> : vector<64xf32>
    %9 = vector.multi_reduction <maximumf>, %8, %cst_5 [1] : vector<64x64xf32> to vector<64xf32>
    %10 = vector.shape_cast %9 : vector<64xf32> to vector<64x1xf32>
    %11 = vector.broadcast %10 : vector<64x1xf32> to vector<64x64xf32>
    %12 = arith.subf %8, %11 : vector<64x64xf32>
    %13 = math.exp %12 : vector<64x64xf32>
    %cst_6 = arith.constant dense<0.000000e+00> : vector<64xf32>
    %14 = vector.multi_reduction <add>, %13, %cst_6 [1] : vector<64x64xf32> to vector<64xf32>
    %15 = vector.shape_cast %14 : vector<64xf32> to vector<64x1xf32>
    %16 = tpu.reciprocal %15 {approx = true} : vector<64x1xf32> -> vector<64x1xf32>
    %17 = vector.broadcast %16 : vector<64x1xf32> to vector<64x64xf32>
    %18 = arith.mulf %13, %17 : vector<64x64xf32>
    %cst_7 = arith.constant dense<0.000000e+00> : vector<64x32xf32>
    %19 = tpu.matmul %18, %6, %cst_7 {dimension_numbers = #tpu.dot_dimension_numbers<[1], [0], [0], [1], [0, 0, 1, 1], [], []>} : vector<64x64xf32>, vector<64x32xf32>, vector<64x32xf32> -> vector<64x32xf32>
    %20 = vector.extract_strided_slice %3 {offsets = [0, 32], sizes = [64, 32], strides = [1, 1]} : vector<64x384xf32> to vector<64x32xf32>
    %21 = vector.extract_strided_slice %3 {offsets = [0, 160], sizes = [64, 32], strides = [1, 1]} : vector<64x384xf32> to vector<64x32xf32>
    %22 = vector.extract_strided_slice %3 {offsets = [0, 288], sizes = [64, 32], strides = [1, 1]} : vector<64x384xf32> to vector<64x32xf32>
    %23 = tpu.transpose %21, [1, 0] : vector<64x32xf32> -> vector<32x64xf32>
    %cst_8 = arith.constant dense<0.000000e+00> : vector<64x64xf32>
    %24 = tpu.matmul %20, %23, %cst_8 {dimension_numbers = #tpu.dot_dimension_numbers<[1], [0], [0], [1], [0, 0, 1, 1], [], []>} : vector<64x32xf32>, vector<32x64xf32>, vector<64x64xf32> -> vector<64x64xf32>
    %cst_9 = arith.constant dense<0xFF800000> : vector<64xf32>
    %25 = vector.multi_reduction <maximumf>, %24, %cst_9 [1] : vector<64x64xf32> to vector<64xf32>
    %26 = vector.shape_cast %25 : vector<64xf32> to vector<64x1xf32>
    %27 = vector.broadcast %26 : vector<64x1xf32> to vector<64x64xf32>
    %28 = arith.subf %24, %27 : vector<64x64xf32>
    %29 = math.exp %28 : vector<64x64xf32>
    %cst_10 = arith.constant dense<0.000000e+00> : vector<64xf32>
    %30 = vector.multi_reduction <add>, %29, %cst_10 [1] : vector<64x64xf32> to vector<64xf32>
    %31 = vector.shape_cast %30 : vector<64xf32> to vector<64x1xf32>
    %32 = tpu.reciprocal %31 {approx = true} : vector<64x1xf32> -> vector<64x1xf32>
    %33 = vector.broadcast %32 : vector<64x1xf32> to vector<64x64xf32>
    %34 = arith.mulf %29, %33 : vector<64x64xf32>
    %cst_11 = arith.constant dense<0.000000e+00> : vector<64x32xf32>
    %35 = tpu.matmul %34, %22, %cst_11 {dimension_numbers = #tpu.dot_dimension_numbers<[1], [0], [0], [1], [0, 0, 1, 1], [], []>} : vector<64x64xf32>, vector<64x32xf32>, vector<64x32xf32> -> vector<64x32xf32>
    %36 = vector.extract_strided_slice %3 {offsets = [0, 64], sizes = [64, 32], strides = [1, 1]} : vector<64x384xf32> to vector<64x32xf32>
    %37 = vector.extract_strided_slice %3 {offsets = [0, 192], sizes = [64, 32], strides = [1, 1]} : vector<64x384xf32> to vector<64x32xf32>
    %38 = vector.extract_strided_slice %3 {offsets = [0, 320], sizes = [64, 32], strides = [1, 1]} : vector<64x384xf32> to vector<64x32xf32>
    %39 = tpu.transpose %37, [1, 0] : vector<64x32xf32> -> vector<32x64xf32>
    %cst_12 = arith.constant dense<0.000000e+00> : vector<64x64xf32>
    %40 = tpu.matmul %36, %39, %cst_12 {dimension_numbers = #tpu.dot_dimension_numbers<[1], [0], [0], [1], [0, 0, 1, 1], [], []>} : vector<64x32xf32>, vector<32x64xf32>, vector<64x64xf32> -> vector<64x64xf32>
    %cst_13 = arith.constant dense<0xFF800000> : vector<64xf32>
    %41 = vector.multi_reduction <maximumf>, %40, %cst_13 [1] : vector<64x64xf32> to vector<64xf32>
    %42 = vector.shape_cast %41 : vector<64xf32> to vector<64x1xf32>
    %43 = vector.broadcast %42 : vector<64x1xf32> to vector<64x64xf32>
    %44 = arith.subf %40, %43 : vector<64x64xf32>
    %45 = math.exp %44 : vector<64x64xf32>
    %cst_14 = arith.constant dense<0.000000e+00> : vector<64xf32>
    %46 = vector.multi_reduction <add>, %45, %cst_14 [1] : vector<64x64xf32> to vector<64xf32>
    %47 = vector.shape_cast %46 : vector<64xf32> to vector<64x1xf32>
    %48 = tpu.reciprocal %47 {approx = true} : vector<64x1xf32> -> vector<64x1xf32>
    %49 = vector.broadcast %48 : vector<64x1xf32> to vector<64x64xf32>
    %50 = arith.mulf %45, %49 : vector<64x64xf32>
    %cst_15 = arith.constant dense<0.000000e+00> : vector<64x32xf32>
    %51 = tpu.matmul %50, %38, %cst_15 {dimension_numbers = #tpu.dot_dimension_numbers<[1], [0], [0], [1], [0, 0, 1, 1], [], []>} : vector<64x64xf32>, vector<64x32xf32>, vector<64x32xf32> -> vector<64x32xf32>
    %52 = vector.extract_strided_slice %3 {offsets = [0, 96], sizes = [64, 32], strides = [1, 1]} : vector<64x384xf32> to vector<64x32xf32>
    %53 = vector.extract_strided_slice %3 {offsets = [0, 224], sizes = [64, 32], strides = [1, 1]} : vector<64x384xf32> to vector<64x32xf32>
    %54 = vector.extract_strided_slice %3 {offsets = [0, 352], sizes = [64, 32], strides = [1, 1]} : vector<64x384xf32> to vector<64x32xf32>
    %55 = tpu.transpose %53, [1, 0] : vector<64x32xf32> -> vector<32x64xf32>
    %cst_16 = arith.constant dense<0.000000e+00> : vector<64x64xf32>
    %56 = tpu.matmul %52, %55, %cst_16 {dimension_numbers = #tpu.dot_dimension_numbers<[1], [0], [0], [1], [0, 0, 1, 1], [], []>} : vector<64x32xf32>, vector<32x64xf32>, vector<64x64xf32> -> vector<64x64xf32>
    %cst_17 = arith.constant dense<0xFF800000> : vector<64xf32>
    %57 = vector.multi_reduction <maximumf>, %56, %cst_17 [1] : vector<64x64xf32> to vector<64xf32>
    %58 = vector.shape_cast %57 : vector<64xf32> to vector<64x1xf32>
    %59 = vector.broadcast %58 : vector<64x1xf32> to vector<64x64xf32>
    %60 = arith.subf %56, %59 : vector<64x64xf32>
    %61 = math.exp %60 : vector<64x64xf32>
    %cst_18 = arith.constant dense<0.000000e+00> : vector<64xf32>
    %62 = vector.multi_reduction <add>, %61, %cst_18 [1] : vector<64x64xf32> to vector<64xf32>
    %63 = vector.shape_cast %62 : vector<64xf32> to vector<64x1xf32>
    %64 = tpu.reciprocal %63 {approx = true} : vector<64x1xf32> -> vector<64x1xf32>
    %65 = vector.broadcast %64 : vector<64x1xf32> to vector<64x64xf32>
    %66 = arith.mulf %61, %65 : vector<64x64xf32>
    %cst_19 = arith.constant dense<0.000000e+00> : vector<64x32xf32>
    %67 = tpu.matmul %66, %54, %cst_19 {dimension_numbers = #tpu.dot_dimension_numbers<[1], [0], [0], [1], [0, 0, 1, 1], [], []>} : vector<64x64xf32>, vector<64x32xf32>, vector<64x32xf32> -> vector<64x32xf32>
    %68 = tpu.concatenate %19, %35, %51, %67 in 1 : vector<64x32xf32>, vector<64x32xf32>, vector<64x32xf32>, vector<64x32xf32> -> vector<64x128xf32>
    %c0_20 = arith.constant 0 : index
    %c0_21 = arith.constant 0 : index
    %69 = vector.load %arg3[%c0_20, %c0_21] : memref<128x4xf32, #tpu.memory_space<vmem>>, vector<128x4xf32>
    %cst_22 = arith.constant dense<0.000000e+00> : vector<64x4xf32>
    %70 = tpu.matmul %68, %69, %cst_22 {dimension_numbers = #tpu.dot_dimension_numbers<[1], [0], [0], [1], [0, 0, 1, 1], [], []>} : vector<64x128xf32>, vector<128x4xf32>, vector<64x4xf32> -> vector<64x4xf32>
    %c0_23 = arith.constant 0 : index
    %c0_24 = arith.constant 0 : index
    %71 = vector.load %arg4[%c0_23, %c0_24] : memref<1x4xf32, #tpu.memory_space<vmem>>, vector<1x4xf32>
    %72 = vector.broadcast %71 : vector<1x4xf32> to vector<64x4xf32>
    %73 = arith.addf %70, %72 : vector<64x4xf32>
    %c0_25 = arith.constant 0 : index
    %c0_26 = arith.constant 0 : index
    %c0_27 = arith.constant 0 : index
    %74 = vector.load %arg5[%c0_25, %c0_26, %c0_27] : memref<1x64x4xf32, #tpu.memory_space<vmem>>, vector<1x64x4xf32>
    %75 = vector.shape_cast %74 : vector<1x64x4xf32> to vector<64x4xf32>
    %76 = vector.shape_cast %73 : vector<64x4xf32> to vector<1x64x4xf32>
    tpu.vector_store %arg5[%c0_25, %c0_26, %c0_27], %76 {strides = array<i32>} : memref<1x64x4xf32, #tpu.memory_space<vmem>>, vector<1x64x4xf32>,
    return
  }
  func.func @transform_0(%arg0: i32) -> (i32, i32, i32) {
    %c0_i32 = arith.constant 0 : i32
    %c0_i32_0 = arith.constant 0 : i32
    %c0_i32_1 = arith.constant 0 : i32
    return %arg0, %c0_i32, %c0_i32_0 : i32, i32, i32
  }
  func.func @transform_1(%arg0: i32) -> (i32, i32) {
    %c0_i32 = arith.constant 0 : i32
    %c0_i32_0 = arith.constant 0 : i32
    %c0_i32_1 = arith.constant 0 : i32
    return %c0_i32, %c0_i32_0 : i32, i32
  }
  func.func @transform_2(%arg0: i32) -> (i32, i32) {
    %c0_i32 = arith.constant 0 : i32
    %c0_i32_0 = arith.constant 0 : i32
    %c0_i32_1 = arith.constant 0 : i32
    return %c0_i32, %c0_i32_0 : i32, i32
  }
  func.func @transform_3(%arg0: i32) -> (i32, i32) {
    %c0_i32 = arith.constant 0 : i32
    %c0_i32_0 = arith.constant 0 : i32
    %c0_i32_1 = arith.constant 0 : i32
    return %c0_i32, %c0_i32_0 : i32, i32
  }
  func.func @transform_4(%arg0: i32) -> (i32, i32, i32) {
    %c0_i32 = arith.constant 0 : i32
    %c0_i32_0 = arith.constant 0 : i32
    %c0_i32_1 = arith.constant 0 : i32
    return %arg0, %c0_i32, %c0_i32_0 : i32, i32, i32
  }
}

</mosaic_0001>

<bundles_post_ra>
// kernel: tpu_custom_call.1
= control target key start
LH: loop header
LB: loop body
LE: loop exit
PB: predicated region body
PF: predicated region fallthrough
CT: control target
= control target key end

     0   :  { %s2125_s15 = smov 0   ;;  %s3020_s0 = inlined_call_operand.vmem [shape: f32[2,64,4], index: 0, kind: input, shape index: {}]   ;;  %s3021_s1 = inlined_call_operand.vmem [shape: f32[4,384], index: 1, kind: input, shape index: {}]   ;;  %s3022_s2 = inlined_call_operand.vmem [shape: f32[128,4], index: 2, kind: input, shape index: {}]   ;;  %s3023_s3 = inlined_call_operand.vmem [shape: f32[1,4], index: 3, kind: input, shape index: {}]   ;;  %s3024_s4 = inlined_call_operand.vmem [shape: f32[2,64,4], index: 4, kind: output, shape index: {}]  }
   0x1 LB: > { %s1714_s16 = sadd.s32 4294967295, %s2095_s15   ;;  %p1718_p0 = scmp.ge.s32.totalorder %s2095_s15, 1  ;;  %s2095_s15 = sphi %s2125_s15, %s14_s15  }
   0x2   : > { %p162_p1 = scmp.lt.s32.totalorder %s2095_s15, 3 }
   0x4   : > { %p163_p2 = pnand %p1718_p0, %p162_p1 }
   0x5   : > { %p188_p3 = scmp.lt.s32.totalorder (!%p163_p2), %s1714_s16, 1  ;;  %s2097_s25 = smov (!%p163_p2), 96  }
   0x6   : > { %166 = sbr.rel (%p163_p2) target bundleno = 1465 (0x5b9), region = 36  ;;  %s2098_s26 = smov (!%p163_p2), 32  }
   0x7   : > { %s2099_s27 = smov (!%p163_p2), 64  }
   0xb   : > { %v206_v0 = vld [vmem:[%s3021_s1] sm:$0xff]  ;;  %s3026_s16 = smov (!%p188_p3, %s1714_s16), 1  ;;  %vm241_vm0 = vcmask 1043456   ;;  %vm216_vm1 = vcmask 31744   ;;  %v207_v9 = vld [vmem:[%s3021_s1 + $0x8] sm:$0xf] }
   0xc   : > { %210 = vst [vmem:[#allocation1] ss:$2 sm:$0xff] %v206_v0  ;;  %s1848_s19 = sshll.u32 %s3026_s16, 6  ;;  %vm371_vm2 = vcmask 261120   ;;  %vm461_vm3 = vcmask 523264   ;;  %vm1581_vm4 = vcmask 785408  }
   0xd   : > { %s2144_s22 = scalar_lea.vmem %s3020_s0, %s1848_s19  ;;  %212 = vst [vmem:[#allocation1 + $0x10] ss:$2 sm:$0xff] %v207_v9  ;;  %s197_s17 = scalar_lea.vmem %s3024_s4, %s1848_s19 }
   0xe   : > { %v198_v1 = vld [vmem:[%s2144_s22] sm:$0xff]  ;;  %v205_v2 = vld [vmem:[%s2144_s22 + $0x38] sm:$0xff]  ;;  %v199_v5 = vld [vmem:[%s2144_s22 + $0x8] sm:$0xff] }
   0xf   : > { %v200_v6 = vld [vmem:[%s2144_s22 + $0x10] sm:$0xff]  ;;  %v201_v7 = vld [vmem:[%s2144_s22 + $0x18] sm:$0xff]  ;;  %v202_v8 = vld [vmem:[%s2144_s22 + $0x20] sm:$0xff] }
  0x10   : > { %v203_v10 = vld [vmem:[%s2144_s22 + $0x28] sm:$0xff]  ;;  %v204_v12 = vld [vmem:[%s2144_s22 + $0x30] sm:$0xff] }
  0x13   : > { %v213_v3 = vld.sshfl [vmem:[#allocation1] sm:$0xff pattern:$0x75316420]  ;;  %v214_v4 = vld.sshfl [vmem:[#allocation1 + $0x8] sm:$0xff pattern:$0x75316420] }
  0x14   : > { %1723 = vmatpush.msk.msra.mxu0 %vm241_vm0, %v213_v3  ;;  %1850 = vmatpush.msk.msra.mxu1 %vm241_vm0, %v213_v3  ;;  %v215_v11 = vld.sshfl [vmem:[#allocation1 + $0x10] sm:$0xff pattern:$0x75316420] }
  0x15   : > { %1724 = vmatmul.msk.f32.vlgmr.msra.gmra.mxu0 %vm216_vm1, %v198_v1  ;;  %1731 = vmatmul.msk.f32.vlgmr.msra.gmra.mxu1 %vm216_vm1, %v205_v2 }
  0x16   : > { %1732 = vmatpush.msk.msrb.mxu1 %vm241_vm0, %v214_v4  ;;  %1741 = vmatpush.msk.msra.mxu2 %vm241_vm0, %v215_v11 }
  0x17   : > { %1742 = vmatmul.msk.f32.vlgmr.msra.gmra.mxu2 %vm216_vm1, %v198_v1 }
  0x1d   : > { %1725 = vmatmul.msk.f32.gmra.mxu0 %vm216_vm1, %v199_v5  ;;  %1733 = vmatmul.msk.f32.vlgmr.msrb.gmra.mxu1 %vm216_vm1, %v198_v1 }
  0x1f   : > { %1743 = vmatmul.msk.f32.gmra.mxu2 %vm216_vm1, %v199_v5 }
  0x25   : > { %1726 = vmatmul.msk.f32.gmra.mxu0 %vm216_vm1, %v200_v6  ;;  %1734 = vmatmul.msk.f32.gmra.mxu1 %vm216_vm1, %v199_v5 }
  0x27   : > { %1744 = vmatmul.msk.f32.gmra.mxu2 %vm216_vm1, %v200_v6 }
  0x2d   : > { %1727 = vmatmul.msk.f32.gmra.mxu0 %vm216_vm1, %v201_v7  ;;  %1735 = vmatmul.msk.f32.gmra.mxu1 %vm216_vm1, %v200_v6 }
  0x2f   : > { %1745 = vmatmul.msk.f32.gmra.mxu2 %vm216_vm1, %v201_v7 }
  0x35   : > { %1728 = vmatmul.msk.f32.gmra.mxu0 %vm216_vm1, %v202_v8  ;;  %1736 = vmatmul.msk.f32.gmra.mxu1 %vm216_vm1, %v201_v7 }
  0x37   : > { %1746 = vmatmul.msk.f32.gmra.mxu2 %vm216_vm1, %v202_v8 }
  0x3d   : > { %1737 = vmatmul.msk.f32.gmra.mxu1 %vm216_vm1, %v202_v8  ;;  %1729 = vmatmul.msk.f32.gmra.mxu0 %vm216_vm1, %v203_v10 }
  0x3f   : > { %1747 = vmatmul.msk.f32.gmra.mxu2 %vm216_vm1, %v203_v10 }
  0x45   : > { %1738 = vmatmul.msk.f32.gmra.mxu1 %vm216_vm1, %v203_v10  ;;  %1730 = vmatmul.msk.f32.gmra.mxu0 %vm216_vm1, %v204_v12 }
  0x47   : > { %1748 = vmatmul.msk.f32.gmra.mxu2 %vm216_vm1, %v204_v12 }
  0x4d   : > { %1739 = vmatmul.msk.f32.gmra.mxu1 %vm216_vm1, %v204_v12 }
  0x4f   : > { %1749 = vmatmul.msk.f32.gmra.mxu2 %vm216_vm1, %v205_v2 }
  0x55   : > { %1740 = vmatmul.msk.f32.gmra.mxu1 %vm216_vm1, %v205_v2 }
  0x92   : > { %v2185_v13 = vpop.f32.mrf.mxu0  ;;  %v2187_v14 = vpop.f32.mrf.mxu1 }
  0x93   : > { %615 = vrot.lane.b32.xlu2 %v2185_v13, %s2097_s25 }
  0x9a   : > { %v2191_v15 = vpop.f32.mrf.mxu0  ;;  %v2193_v16 = vpop.f32.mrf.mxu1 }
  0x9b   : > { %631 = vrot.lane.b32.xlu1 %v2193_v16, %s2097_s25  ;;  %617 = vrot.lane.b32.xlu0 %v2191_v15, %s2097_s25  ;;  %v2237_v29 = vpop.f32.mrf.mxu2 }
  0xa2   : > { %v2199_v17 = vpop.f32.mrf.mxu0  ;;  %v309_v18 = vpop.f32.mrf.mxu1 }
  0xa3   : > { %633 = vrot.lane.b32.xlu0 %v309_v18, %s2097_s25  ;;  %619 = vrot.lane.b32.xlu1 %v2199_v17, %s2097_s25  ;;  %v2247_v30 = vpop.f32.mrf.mxu2 }
  0xa4   : > { %v2360_v54 = vpack.i.bf16 %v2237_v29, %v2247_v30 }
  0xaa   : > { %v2204_v19 = vpop.f32.mrf.mxu0  ;;  %v312_v20 = vpop.f32.mrf.mxu1 }
  0xab   : > { %635 = vrot.lane.b32.xlu2 %v312_v20, %s2097_s25  ;;  %v2256_v31 = vpop.f32.mrf.mxu2 }
  0xb2   : > { %v2207_v21 = vpop.f32.mrf.mxu0  ;;  %v315_v22 = vpop.f32.mrf.mxu1 }
  0xb3   : > { %621 = vrot.lane.b32.xlu2 %v2204_v19, %s2097_s25  ;;  %623 = vrot.lane.b32.xlu0 %v2207_v21, %s2097_s25  ;;  %v356_v32 = vpop.f32.mrf.mxu2 }
  0xb4   : > { %v2350_v50 = vpack.i.bf16 %v2256_v31, %v356_v32 }
  0xba   : > { %v318_v23 = vpop.f32.mrf.mxu1  ;;  %v2219_v25 = vpop.f32.mrf.mxu0 }
  0xbb   : > { %639 = vrot.lane.b32.xlu1 %v318_v23, %s2097_s25  ;;  %637 = vrot.lane.b32.xlu2 %v315_v22, %s2097_s25  ;;  %v359_v33 = vpop.f32.mrf.mxu2 }
  0xbc   : > { %1211 = vrot.lane.b32.xlu0 %v318_v23, %s2098_s26 }
  0xc2   : > { %v321_v24 = vpop.f32.mrf.mxu1  ;;  %v2225_v27 = vpop.f32.mrf.mxu0 }
  0xc3   : > { %641 = vrot.lane.b32.xlu1 %v321_v24, %s2097_s25  ;;  %927 = vrot.lane.b32.xlu2 %v315_v22, %s2099_s27  ;;  %v362_v35 = vpop.f32.mrf.mxu2 }
  0xc4   : > { %931 = vrot.lane.b32.xlu0 %v321_v24, %s2099_s27  ;;  %v2338_v47 = vpack.i.bf16 %v359_v33, %v362_v35 }
  0xca   : > { %v324_v26 = vpop.f32.mrf.mxu1 }
  0xcb   : > { %1213 = vrot.lane.b32.xlu1 %v321_v24, %s2098_s26  ;;  %625 = vrot.lane.b32.xlu2 %v2219_v25, %s2097_s25  ;;  %v365_v37 = vpop.f32.mrf.mxu2 }
  0xcc   : > { %643 = vrot.lane.b32.xlu0 %v324_v26, %s2097_s25 }
  0xd2   : > { %v2227_v28 = vpop.f32.mrf.mxu1 }
  0xd3   : > { %1750 = vmatpush.xpose.msk.msrb.mxu0 %vm371_vm2, %v2227_v28  ;;  %1851 = vmatpush.xpose.msk.msra.mxu3 %vm371_vm2, %v2227_v28  ;;  %v368_v39 = vpop.f32.mrf.mxu2 }
  0xd4   : > { %933 = vrot.lane.b32.xlu0 %v324_v26, %s2099_s27  ;;  %929 = vrot.lane.b32.xlu2 %v318_v23, %s2099_s27  ;;  %v1870_v45 = vpack.i.bf16 %v365_v37, %v368_v39 }
  0xd5   : > { %627 = vrot.lane.b32.xlu1 %v2225_v27, %s2097_s25 }
  0xd7   : > { %1751 = vmatpush.xpose.msk.msrb.mxu0 %vm371_vm2, %v324_v26  ;;  %1852 = vmatpush.xpose.msk.msra.mxu3 %vm371_vm2, %v324_v26 }
  0xdb   : > { %1752 = vmatpush.xpose.msk.msrb.mxu0 %vm371_vm2, %v321_v24  ;;  %1853 = vmatpush.xpose.msk.msra.mxu3 %vm371_vm2, %v321_v24 }
  0xdc   : > { %645 = vrot.lane.b32.xlu0 %v2227_v28, %s2097_s25  ;;  %1207 = vrot.lane.b32.xlu2 %v312_v20, %s2098_s26 }
  0xdd   : > { %1215 = vrot.lane.b32.xlu1 %v324_v26, %s2098_s26 }
  0xdf   : > { %1753 = vmatpush.xpose.msk.msrb.mxu0 %vm371_vm2, %v318_v23  ;;  %1854 = vmatpush.xpose.msk.msra.mxu3 %vm371_vm2, %v318_v23 }
  0xe3   : > { %1754 = vmatpush.xpose.msk.msrb.mxu0 %vm371_vm2, %v315_v22  ;;  %1855 = vmatpush.xpose.msk.msra.mxu3 %vm371_vm2, %v315_v22 }
  0xe4   : > { %1209 = vrot.lane.b32.xlu0 %v315_v22, %s2098_s26  ;;  %1205 = vrot.lane.b32.xlu2 %v309_v18, %s2098_s26 }
  0xe5   : > { %925 = vrot.lane.b32.xlu1 %v312_v20, %s2099_s27 }
  0xe7   : > { %1755 = vmatpush.xpose.msk.msrb.mxu0 %vm371_vm2, %v312_v20  ;;  %1856 = vmatpush.xpose.msk.msra.mxu3 %vm371_vm2, %v312_v20 }
  0xeb   : > { %1756 = vmatpush.xpose.msk.msrb.mxu0 %vm371_vm2, %v309_v18  ;;  %1857 = vmatpush.xpose.msk.msra.mxu3 %vm371_vm2, %v309_v18 }
  0xec   : > { %629 = vrot.lane.b32.xlu0 %v2187_v14, %s2097_s25  ;;  %905 = vrot.lane.b32.xlu2 %v2185_v13, %s2099_s27 }
  0xed   : > { %923 = vrot.lane.b32.xlu1 %v309_v18, %s2099_s27  ;;  %v2285_v34 = vpop.permute.xlu2 %615 }
  0xef   : > { %1757 = vmatpush.xpose.msk.msrb.mxu0 %vm371_vm2, %v2193_v16  ;;  %1858 = vmatpush.xpose.msk.msra.mxu3 %vm371_vm2, %v2193_v16 }
  0xf2   : > { %1758 = vmatmul.msk.f32.vlgmr.msrb.gmra.mxu0 %vm371_vm2, %v2185_v13  ;;  %1760 = vmatmul.msk.f32.vlgmr.msra.gmra.mxu3 %vm371_vm2, %v2199_v17 }
  0xf3   : > { %582 = vmatpush.msra.mxu0 %v368_v39 }
  0xf4   : > { %921 = vrot.lane.b32.xlu0 %v2193_v16, %s2099_s27  ;;  %1189 = vrot.lane.b32.xlu2 %v2191_v15, %s2098_s26 }
  0xf5   : > { %1203 = vrot.lane.b32.xlu1 %v2193_v16, %s2098_s26  ;;  %583 = vmatpush.msra.mxu0 %v365_v37 }
  0xf7   : > { %584 = vmatpush.msra.mxu0 %v362_v35 }
  0xf9   : > { %585 = vmatpush.msra.mxu0 %v359_v33 }
  0xfa   : > { %1759 = vmatmul.msk.f32.gmra.mxu0 %vm371_vm2, %v2191_v15  ;;  %1761 = vmatmul.msk.f32.gmra.mxu3 %vm371_vm2, %v2204_v19 }
  0xfb   : > { %586 = vmatpush.msra.mxu0 %v356_v32 }
  0xfc   : > { %1187 = vrot.lane.b32.xlu0 %v2185_v13, %s2098_s26  ;;  %911 = vrot.lane.b32.xlu2 %v2204_v19, %s2099_s27 }
  0xfd   : > { %907 = vrot.lane.b32.xlu1 %v2191_v15, %s2099_s27  ;;  %587 = vmatpush.msra.mxu0 %v2256_v31 }
  0xff   : > { %588 = vmatpush.msra.mxu0 %v2247_v30 }
 0x101   : > { %589 = vmatpush.msra.mxu0 %v2237_v29 }
 0x102   : > { %1762 = vmatmul.msk.f32.gmra.mxu3 %vm371_vm2, %v2207_v21 }
 0x104   : > { %909 = vrot.lane.b32.xlu0 %v2199_v17, %s2099_s27  ;;  %1195 = vrot.lane.b32.xlu2 %v2207_v21, %s2098_s26 }
 0x105   : > { %1191 = vrot.lane.b32.xlu1 %v2199_v17, %s2098_s26  ;;  %v2301_v36 = vpop.permute.xlu2 %635 }
 0x10a   : > { %1763 = vmatmul.msk.f32.gmra.mxu3 %vm371_vm2, %v2219_v25 }
 0x10c   : > { %1193 = vrot.lane.b32.xlu0 %v2204_v19, %s2098_s26  ;;  %1217 = vrot.lane.b32.xlu2 %v2227_v28, %s2098_s26 }
 0x10d   : > { %913 = vrot.lane.b32.xlu1 %v2207_v21, %s2099_s27  ;;  %v2311_v38 = vpop.permute.xlu2 %621  ;;  %v2315_v40 = vpop.permute.xlu0 %617 }
 0x10e   : > { %v632_v42 = vpop.permute.xlu1 %631 }
 0x112   : > { %1764 = vmatmul.msk.f32.gmra.mxu3 %vm371_vm2, %v2225_v27 }
 0x114   : > { %915 = vrot.lane.b32.xlu0 %v2219_v25, %s2099_s27  ;;  %917 = vrot.lane.b32.xlu2 %v2225_v27, %s2099_s27 }
 0x115   : > { %1197 = vrot.lane.b32.xlu1 %v2219_v25, %s2098_s26  ;;  %v638_v41 = vpop.permute.xlu2 %637  ;;  %v634_v43 = vpop.permute.xlu0 %633 }
 0x116   : > { %v2336_v46 = vpop.permute.xlu1 %619 }
 0x11a   : > { %1765 = vmatmul.msk.f32.gmra.mxu3 %vm371_vm2, %v2187_v14 }
 0x11c   : > { %1199 = vrot.lane.b32.xlu0 %v2225_v27, %s2098_s26  ;;  %1201 = vrot.lane.b32.xlu2 %v2187_v14, %s2098_s26 }
 0x11d   : > { %935 = vrot.lane.b32.xlu1 %v2227_v28, %s2099_s27  ;;  %v2334_v44 = vpop.permute.xlu2 %927 }
 0x124   : > { %1871 = vrot.lane.b32.xlu2 %v1870_v45, %s2097_s25  ;;  %1896 = vrot.lane.b32.xlu0 %v2338_v47, %s2098_s26 }
 0x125   : > { %919 = vrot.lane.b32.xlu1 %v2187_v14, %s2099_s27  ;;  %v2343_v48 = vpop.permute.xlu0 %623  ;;  %v2347_v49 = vpop.permute.xlu2 %625 }
 0x12c   : > { %1881 = vrot.lane.b32.xlu2 %v2350_v50, %s2097_s25 }
 0x12d   : > { %v640_v51 = vpop.permute.xlu1 %639  ;;  %1876 = vrot.lane.b32.xlu1 %v2338_v47, %s2097_s25 }
 0x12e   : > { %v1212_v52 = vpop.permute.xlu0 %1211  ;;  %v2356_v53 = vpop.permute.xlu2 %929 }
 0x134   : > { %1886 = vrot.lane.b32.xlu2 %v2360_v54, %s2097_s25 }
 0x135   : > { %v642_v55 = vpop.permute.xlu1 %641  ;;  %1891 = vrot.lane.b32.xlu1 %v1870_v45, %s2098_s26 }
 0x136   : > { %v2365_v56 = vpop.permute.xlu0 %931  ;;  %v1208_v57 = vpop.permute.xlu2 %1207 }
 0x13c   : > { %1901 = vrot.lane.b32.xlu2 %v1870_v45, %s2099_s27 }
 0x13d   : > { %v1214_v58 = vpop.permute.xlu1 %1213 }
 0x13e   : > { %v644_v59 = vpop.permute.xlu0 %643  ;;  %v1206_v60 = vpop.permute.xlu2 %1205 }
 0x144   : > { %1906 = vrot.lane.b32.xlu2 %v2350_v50, %s2098_s26 }
 0x146   : > { %v2370_v61 = vpop.permute.xlu0 %933  ;;  %v2372_v62 = vpop.permute.xlu2 %905 }
 0x147   : > { %v2374_v63 = vpop.permute.xlu1 %627 }
 0x14e   : > { %v646_v0 = vpop.permute.xlu0 %645  ;;  %v2376_v1 = vpop.permute.xlu2 %1189 }
 0x14f   : > { %v1216_v2 = vpop.permute.xlu1 %1215  ;;  %1774 = vmatpush.xpose.msk.msra.mxu1 %vm371_vm2, %v646_v0 }
 0x153   : > { %1775 = vmatpush.xpose.msk.msra.mxu1 %vm371_vm2, %v644_v59 }
 0x156   : > { %v2380_v3 = vpop.permute.xlu2 %911  ;;  %v1210_v5 = vpop.permute.xlu0 %1209 }
 0x157   : > { %v2382_v4 = vpop.permute.xlu1 %925  ;;  %1776 = vmatpush.xpose.msk.msra.mxu1 %vm371_vm2, %v642_v55 }
 0x15b   : > { %1777 = vmatpush.xpose.msk.msra.mxu1 %vm371_vm2, %v640_v51 }
 0x15e   : > { %v2386_v6 = vpop.permute.xlu2 %1195  ;;  %v2393_v8 = vpop.permute.xlu0 %629 }
 0x15f   : > { %v2388_v7 = vpop.permute.xlu1 %923  ;;  %1778 = vmatpush.xpose.msk.msra.mxu1 %vm371_vm2, %v638_v41 }
 0x163   : > { %1779 = vmatpush.xpose.msk.msra.mxu1 %vm371_vm2, %v2301_v36 }
 0x166   : > { %v1218_v9 = vpop.permute.xlu2 %1217  ;;  %v2406_v14 = vpop.permute.xlu0 %921 }
 0x167   : > { %v1204_v10 = vpop.permute.xlu1 %1203  ;;  %1780 = vmatpush.xpose.msk.msra.mxu1 %vm371_vm2, %v634_v43 }
 0x16b   : > { %1781 = vmatpush.xpose.msk.msra.mxu1 %vm371_vm2, %v632_v42 }
 0x16e   : > { %1782 = vmatmul.msk.f32.vlgmr.msra.gmra.mxu1 %vm371_vm2, %v2285_v34  ;;  %v2400_v11 = vpop.permute.xlu2 %917  ;;  %v2427_v22 = vpop.permute.xlu0 %1187 }
 0x16f   : > { %1822 = vmatpush.xpose.msk.msrb.mxu1 %vm371_vm2, %v1218_v9  ;;  %v2402_v12 = vpop.permute.xlu1 %907  ;;  %v2404_v13 = vpop.f32.mrf.mxu0 }
 0x170   : > { %v462_v15 = vsel %vm461_vm3, %v2404_v13, -inf }
 0x171   : > { %463 = vmax.xlane.f32.xlu1 %v462_v15 }
 0x173   : > { %1823 = vmatpush.xpose.msk.msrb.mxu1 %vm371_vm2, %v1216_v2 }
 0x175   : > { %v2412_v16 = vpop.f32.mrf.mxu3 }
 0x176   : > { %1783 = vmatmul.msk.f32.gmra.mxu1 %vm371_vm2, %v2315_v40  ;;  %v2416_v17 = vpop.permute.xlu2 %1201  ;;  %v468_v20 = vsel %vm461_vm3, %v2412_v16, -inf  ;;  %v2439_v29 = vpop.permute.xlu0 %909 }
 0x177   : > { %1824 = vmatpush.xpose.msk.msrb.mxu1 %vm371_vm2, %v1214_v58  ;;  %v2418_v18 = vpop.permute.xlu1 %1191  ;;  %v2420_v19 = vpop.f32.mrf.mxu0 }
 0x178   : > { %v465_v21 = vsel %vm461_vm3, %v2420_v19, -inf }
 0x179   : > { %469 = vmax.xlane.f32.xlu1 %v468_v20  ;;  %466 = vmax.xlane.f32.xlu2 %v465_v21 }
 0x17b   : > { %1825 = vmatpush.xpose.msk.msrb.mxu1 %vm371_vm2, %v1212_v52 }
 0x17d   : > { %v2430_v23 = vpop.f32.mrf.mxu3 }
 0x17e   : > { %1784 = vmatmul.msk.f32.gmra.mxu1 %vm371_vm2, %v2336_v46  ;;  %v471_v24 = vsel %vm461_vm3, %v2430_v23, -inf  ;;  %v1872_v26 = vpop.permute.xlu2 %1871  ;;  %v2453_v35 = vpop.permute.xlu0 %1193 }
 0x17f   : > { %1826 = vmatpush.xpose.msk.msrb.mxu1 %vm371_vm2, %v1210_v5  ;;  %v2436_v25 = vpop.permute.xlu1 %913  ;;  %472 = vmax.xlane.f32.xlu0 %v471_v24  ;;  %v1873_v27 = vunpack.i.l.bf16 %v1872_v26  ;;  %v1874_v28 = vunpack.i.h.bf16 %v1872_v26 }
 0x181   : > { %872 = vmatpush.msrb.mxu2 %v1873_v27 }
 0x183   : > { %1827 = vmatpush.xpose.msk.msrb.mxu1 %vm371_vm2, %v1208_v57  ;;  %873 = vmatpush.msrb.mxu2 %v1874_v28 }
 0x185   : > { %v2442_v30 = vpop.f32.mrf.mxu3 }
 0x186   : > { %1785 = vmatmul.msk.f32.gmra.mxu1 %vm371_vm2, %v2311_v38  ;;  %v474_v31 = vsel %vm461_vm3, %v2442_v30, -inf  ;;  %v1882_v33 = vpop.permute.xlu2 %1881  ;;  %v916_v42 = vpop.permute.xlu0 %915 }
 0x187   : > { %1828 = vmatpush.xpose.msk.msrb.mxu1 %vm371_vm2, %v1206_v60  ;;  %v2448_v32 = vpop.permute.xlu1 %1197  ;;  %475 = vmax.xlane.f32.xlu2 %v474_v31  ;;  %v1884_v57 = vunpack.i.h.bf16 %v1882_v33 }
 0x18b   : > { %1829 = vmatpush.xpose.msk.msrb.mxu1 %vm371_vm2, %v1204_v10 }
 0x18d   : > { %v2451_v34 = vpop.f32.mrf.mxu3 }
 0x18e   : > { %1786 = vmatmul.msk.f32.gmra.mxu1 %vm371_vm2, %v2343_v48  ;;  %v477_v36 = vsel %vm461_vm3, %v2451_v34, -inf  ;;  %v1887_v38 = vpop.permute.xlu2 %1886 }
 0x18f   : > { %v936_v37 = vpop.permute.xlu1 %935  ;;  %478 = vmax.xlane.f32.xlu1 %v477_v36  ;;  %v1888_v58 = vunpack.i.l.bf16 %v1887_v38 }
 0x190   : > { %1798 = vmatpush.xpose.msk.msrb.mxu3 %vm371_vm2, %v936_v37 }
 0x194   : > { %1799 = vmatpush.xpose.msk.msrb.mxu3 %vm371_vm2, %v2370_v61 }
 0x195   : > { %v2462_v39 = vpop.f32.mrf.mxu3 }
 0x196   : > { %1787 = vmatmul.msk.f32.gmra.mxu1 %vm371_vm2, %v2347_v49  ;;  %v480_v40 = vsel %vm461_vm3, %v2462_v39, -inf  ;;  %v1902_v46 = vpop.permute.xlu2 %1901 }
 0x197   : > { %v2468_v41 = vpop.permute.xlu1 %919  ;;  %481 = vmax.xlane.f32.xlu0 %v480_v40  ;;  %v1904_v49 = vunpack.i.h.bf16 %v1902_v46  ;;  %v1903_v51 = vunpack.i.l.bf16 %v1902_v46 }
 0x198   : > { %1800 = vmatpush.xpose.msk.msrb.mxu3 %vm371_vm2, %v2365_v56  ;;  %v1883_v56 = vunpack.i.l.bf16 %v1882_v33 }
 0x199   : > { %1154 = vmatpush.msrb.mxu0 %v1903_v51 }
 0x19b   : > { %1155 = vmatpush.msrb.mxu0 %v1904_v49 }
 0x19c   : > { %1801 = vmatpush.xpose.msk.msrb.mxu3 %vm371_vm2, %v2356_v53  ;;  %v1200_v53 = vpop.permute.xlu0 %1199 }
 0x19d   : > { %v2474_v43 = vpop.f32.mrf.mxu3 }
 0x19e   : > { %1788 = vmatmul.msk.f32.gmra.mxu1 %vm371_vm2, %v2374_v63  ;;  %v483_v45 = vsel %vm461_vm3, %v2474_v43, -inf  ;;  %v1907_v2 = vpop.permute.xlu2 %1906 }
 0x19f   : > { %484 = vmax.xlane.f32.xlu2 %v483_v45  ;;  %v1877_v48 = vpop.permute.xlu1 %1876  ;;  %v1908_v5 = vunpack.i.l.bf16 %v1907_v2 }
 0x1a0   : > { %1802 = vmatpush.xpose.msk.msrb.mxu3 %vm371_vm2, %v2334_v44  ;;  %v1878_v52 = vunpack.i.l.bf16 %v1877_v48  ;;  %v1879_v55 = vunpack.i.h.bf16 %v1877_v48  ;;  %v1889_v44 = vunpack.i.h.bf16 %v1887_v38 }
 0x1a2   : > { %874 = vmatpush.msrb.mxu2 %v1878_v52 }
 0x1a4   : > { %1803 = vmatpush.xpose.msk.msrb.mxu3 %vm371_vm2, %v2382_v4  ;;  %875 = vmatpush.msrb.mxu2 %v1879_v55  ;;  %v1897_v61 = vpop.permute.xlu0 %1896 }
 0x1a5   : > { %v1898_v0 = vunpack.i.l.bf16 %v1897_v61  ;;  %v1899_v4 = vunpack.i.h.bf16 %v1897_v61 }
 0x1a6   : > { %1789 = vmatmul.msk.f32.gmra.mxu1 %vm371_vm2, %v2393_v8  ;;  %876 = vmatpush.msrb.mxu2 %v1883_v56 }
 0x1a7   : > { %v1892_v59 = vpop.permute.xlu1 %1891 }
 0x1a8   : > { %1804 = vmatpush.xpose.msk.msrb.mxu3 %vm371_vm2, %v2388_v7  ;;  %877 = vmatpush.msrb.mxu2 %v1884_v57  ;;  %v1893_v60 = vunpack.i.l.bf16 %v1892_v59  ;;  %v1894_v63 = vunpack.i.h.bf16 %v1892_v59  ;;  %v1909_v7 = vunpack.i.h.bf16 %v1907_v2 }
 0x1aa   : > { %878 = vmatpush.msrb.mxu2 %v1888_v58 }
 0x1ac   : > { %1805 = vmatpush.xpose.msk.msrb.mxu3 %vm371_vm2, %v2406_v14  ;;  %879 = vmatpush.msrb.mxu2 %v1889_v44 }
 0x1ae   : > { %1436 = vmatpush.msra.mxu2 %v1893_v60  ;;  %1830 = vmatmul.msk.f32.vlgmr.msrb.gmra.mxu1 %vm371_vm2, %v2427_v22 }
 0x1af   : > { %1806 = vmatmul.msk.f32.vlgmr.msrb.gmra.mxu3 %vm371_vm2, %v2372_v62 }
 0x1b0   : > { %1437 = vmatpush.msra.mxu2 %v1894_v63 }
 0x1b2   : > { %1438 = vmatpush.msra.mxu2 %v1898_v0 }
 0x1b4   : > { %1439 = vmatpush.msra.mxu2 %v1899_v4 }
 0x1b6   : > { %1440 = vmatpush.msra.mxu2 %v1908_v5  ;;  %1831 = vmatmul.msk.f32.gmra.mxu1 %vm371_vm2, %v2376_v1 }
 0x1b7   : > { %1807 = vmatmul.msk.f32.gmra.mxu3 %vm371_vm2, %v2402_v12 }
 0x1b8   : > { %1441 = vmatpush.msra.mxu2 %v1909_v7 }
 0x1be   : > { %1832 = vmatmul.msk.f32.gmra.mxu1 %vm371_vm2, %v2418_v18 }
 0x1bf   : > { %1808 = vmatmul.msk.f32.gmra.mxu3 %vm371_vm2, %v2439_v29 }
 0x1c6   : > { %1833 = vmatmul.msk.f32.gmra.mxu1 %vm371_vm2, %v2453_v35 }
 0x1c7   : > { %1809 = vmatmul.msk.f32.gmra.mxu3 %vm371_vm2, %v2380_v3 }
 0x1ce   : > { %1834 = vmatmul.msk.f32.gmra.mxu1 %vm371_vm2, %v2386_v6 }
 0x1cf   : > { %1810 = vmatmul.msk.f32.gmra.mxu3 %vm371_vm2, %v2436_v25 }
 0x1d6   : > { %1835 = vmatmul.msk.f32.gmra.mxu1 %vm371_vm2, %v2448_v32 }
 0x1d7   : > { %1811 = vmatmul.msk.f32.gmra.mxu3 %vm371_vm2, %v916_v42 }
 0x1de   : > { %1836 = vmatmul.msk.f32.gmra.mxu1 %vm371_vm2, %v1200_v53 }
 0x1df   : > { %1812 = vmatmul.msk.f32.gmra.mxu3 %vm371_vm2, %v2400_v11 }
 0x1e4   : > { %v464_v62 = vpop.xlane.xlu1 %463 }
 0x1e5   : > { %v486_v1 = vsub.f32 %v2404_v13, %v464_v62 }
 0x1e6   : > { %1837 = vmatmul.msk.f32.gmra.mxu1 %vm371_vm2, %v2416_v17 }
 0x1e7   : > { %v494_v3 = vmul.f32 1.442695, %v486_v1  ;;  %1813 = vmatmul.msk.f32.gmra.mxu3 %vm371_vm2, %v2468_v41 }
 0x1e9   : > { %1961 = vpow2.f32 %v494_v3 }
 0x1eb   : > { %v2521_v6 = vpop.f32.mrf.mxu1 }
 0x1ec   : > { %v720_v8 = vsel %vm461_vm3, %v2521_v6, -inf  ;;  %v470_v27 = vpop.xlane.xlu1 %469  ;;  %v467_v33 = vpop.xlane.xlu2 %466 }
 0x1ed   : > { %721 = vmax.xlane.f32.xlu0 %v720_v8  ;;  %v488_v28 = vsub.f32 %v2412_v16, %v470_v27  ;;  %v487_v36 = vsub.f32 %v2420_v19, %v467_v33 }
 0x1ef   : > { %v2525_v9 = vpop.eup %1961  ;;  %v498_v32 = vmul.f32 1.442695, %v488_v28  ;;  %v496_v40 = vmul.f32 1.442695, %v487_v36 }
 0x1f0   : > { %v510_v10 = vsel %vm461_vm3, %v2525_v9, 0.0 }
 0x1f1   : > { %511 = vadd.xlane.f32.xlu1 %v510_v10 }
 0x1f2   : > { %v473_v11 = vpop.xlane.xlu0 %472 }
 0x1f3   : > { %v2529_v12 = vpop.f32.mrf.mxu1  ;;  %v489_v13 = vsub.f32 %v2430_v23, %v473_v11 }
 0x1f4   : > { %v723_v14 = vsel %vm461_vm3, %v2529_v12, -inf }
 0x1f5   : > { %v500_v15 = vmul.f32 1.442695, %v489_v13  ;;  %724 = vmax.xlane.f32.xlu2 %v723_v14 }
 0x1f7   : > { %1963 = vpow2.f32 %v500_v15 }
 0x1f8   : > { %1965 = vpow2.f32 %v498_v32 }
 0x1f9   : > { %1967 = vpow2.f32 %v496_v40 }
 0x1fa   : > { %v476_v41 = vpop.xlane.xlu2 %475 }
 0x1fb   : > { %v2538_v20 = vpop.f32.mrf.mxu1  ;;  %v490_v46 = vsub.f32 %v2442_v30, %v476_v41 }
 0x1fc   : > { %v726_v38 = vsel %vm461_vm3, %v2538_v20, -inf }
 0x1fd   : > { %v2534_v17 = vpop.eup %1963  ;;  %v502_v53 = vmul.f32 1.442695, %v490_v46 }
 0x1fe   : > { %v519_v18 = vsel %vm461_vm3, %v2534_v17, 0.0  ;;  %v2566_v45 = vpop.eup %1965 }
 0x1ff   : > { %520 = vadd.xlane.f32.xlu1 %v519_v18  ;;  %v516_v52 = vsel %vm461_vm3, %v2566_v45, 0.0  ;;  %v2580_v56 = vpop.eup %1967  ;;  %1969 = vpow2.f32 %v502_v53 }
 0x200   : > { %v513_v57 = vsel %vm461_vm3, %v2580_v56, 0.0 }
 0x202   : > { %v479_v63 = vpop.xlane.xlu1 %478 }
 0x203   : > { %v2540_v21 = vpop.f32.mrf.mxu1  ;;  %v491_v15 = vsub.f32 %v2451_v34, %v479_v63 }
 0x204   : > { %v729_v55 = vsel %vm461_vm3, %v2540_v21, -inf }
 0x205   : > { %v2588_v59 = vpop.eup %1969  ;;  %v504_v18 = vmul.f32 1.442695, %v491_v15 }
 0x206   : > { %v522_v61 = vsel %vm461_vm3, %v2588_v59, 0.0 }
 0x20a   : > { %v482_v42 = vpop.xlane.xlu0 %481 }
 0x20b   : > { %v2542_v22 = vpop.f32.mrf.mxu1  ;;  %v492_v19 = vsub.f32 %v2462_v39, %v482_v42 }
 0x20c   : > { %v732_v39 = vsel %vm461_vm3, %v2542_v22, -inf }
 0x20d   : > { %v506_v30 = vmul.f32 1.442695, %v492_v19 }
 0x20f   : > { %1971 = vpow2.f32 %v506_v30 }
 0x212   : > { %v485_v27 = vpop.xlane.xlu2 %484 }
 0x213   : > { %v2544_v24 = vpop.f32.mrf.mxu1  ;;  %v493_v32 = vsub.f32 %v2474_v43, %v485_v27 }
 0x214   : > { %v735_v3 = vsel %vm461_vm3, %v2544_v24, -inf }
 0x215   : > { %v2590_v44 = vpop.eup %1971 }
 0x216   : > { %v528_v60 = vsel %vm461_vm3, %v2590_v44, 0.0 }
 0x21b   : > { %v2550_v26 = vpop.f32.mrf.mxu1 }
 0x223   : > { %v2557_v35 = vpop.f32.mrf.mxu1 }
 0x22b   : > { %v2570_v48 = vpop.f32.mrf.mxu1 }
 0x232   : > { %v2546_v23 = vpop.f32.mrf.mxu3 }
 0x233   : > { %v1010_v25 = vsel %vm461_vm3, %v2546_v23, -inf  ;;  %v2586_v58 = vpop.f32.mrf.mxu1 }
 0x234   : > { %1011 = vmax.xlane.f32.xlu0 %v1010_v25  ;;  %v1295_v4 = vsel %vm461_vm3, %v2586_v58, -inf }
 0x23a   : > { %v2553_v29 = vpop.f32.mrf.mxu3 }
 0x23b   : > { %v1013_v31 = vsel %vm461_vm3, %v2553_v29, -inf  ;;  %v2596_v0 = vpop.f32.mrf.mxu1 }
 0x23c   : > { %1014 = vmax.xlane.f32.xlu0 %v1013_v31  ;;  %v1292_v31 = vsel %vm461_vm3, %v2570_v48, -inf }
 0x242   : > { %v2560_v37 = vpop.f32.mrf.mxu3 }
 0x243   : > { %v1016_v16 = vsel %vm461_vm3, %v2560_v37, -inf  ;;  %v2606_v62 = vpop.f32.mrf.mxu1 }
 0x244   : > { %727 = vmax.xlane.f32.xlu0 %v726_v38  ;;  %1017 = vmax.xlane.f32.xlu2 %v1016_v16  ;;  %v1301_v1 = vsel %vm461_vm3, %v2606_v62, -inf  ;;  %v508_v38 = vmul.f32 1.442695, %v493_v32 }
 0x24a   : > { %v2572_v49 = vpop.f32.mrf.mxu3 }
 0x24b   : > { %v1019_v51 = vsel %vm461_vm3, %v2572_v49, -inf  ;;  %v2625_v25 = vpop.f32.mrf.mxu1 }
 0x24c   : > { %1020 = vmax.xlane.f32.xlu1 %v1019_v51  ;;  %517 = vadd.xlane.f32.xlu0 %v516_v52  ;;  %v1304_v40 = vsel %vm461_vm3, %v2625_v25, -inf }
 0x24d   : > { %730 = vmax.xlane.f32.xlu2 %v729_v55 }
 0x252   : > { %v2598_v2 = vpop.f32.mrf.mxu3 }
 0x253   : > { %v1022_v5 = vsel %vm461_vm3, %v2598_v2, -inf  ;;  %v2634_v33 = vpop.f32.mrf.mxu1 }
 0x254   : > { %733 = vmax.xlane.f32.xlu1 %v732_v39  ;;  %514 = vadd.xlane.f32.xlu0 %v513_v57  ;;  %v1298_v39 = vsel %vm461_vm3, %v2596_v0, -inf }
 0x25a   : > { %v2613_v11 = vpop.f32.mrf.mxu3 }
 0x25b   : > { %v1025_v41 = vsel %vm461_vm3, %v2613_v11, -inf  ;;  %v2641_v46 = vpop.f32.mrf.mxu1 }
 0x25c   : > { %529 = vadd.xlane.f32.xlu1 %v528_v60  ;;  %523 = vadd.xlane.f32.xlu0 %v522_v61  ;;  %v1307_v61 = vsel %vm461_vm3, %v2634_v33, -inf }
 0x260   : > { %v722_v36 = vpop.xlane.xlu0 %721 }
 0x261   : > { %v744_v16 = vsub.f32 %v2521_v6, %v722_v36  ;;  %v1310_v6 = vsel %vm461_vm3, %v2641_v46, -inf }
 0x262   : > { %v2618_v13 = vpop.f32.mrf.mxu3 }
 0x263   : > { %v1028_v14 = vsel %vm461_vm3, %v2618_v13, -inf  ;;  %v752_v43 = vmul.f32 1.442695, %v744_v16 }
 0x264   : > { %1296 = vmax.xlane.f32.xlu1 %v1295_v4  ;;  %1023 = vmax.xlane.f32.xlu0 %v1022_v5  ;;  %v512_v7 = vpop.xlane.xlu1 %511 }
 0x265   : > { %1911 = vrot.lane.b32.xlu2 %v2338_v47, %s2099_s27  ;;  %1973 = vrcp.f32 %v512_v7  ;;  %v738_v47 = vsel %vm461_vm3, %v2550_v26, -inf }
 0x266   : > { %1975 = vpow2.f32 %v504_v18 }
 0x267   : > { %1977 = vpow2.f32 %v508_v38 }
 0x268   : > { %v725_v42 = vpop.xlane.xlu2 %724  ;;  %1979 = vpow2.f32 %v752_v43 }
 0x269   : > { %v745_v51 = vsub.f32 %v2529_v12, %v725_v42 }
 0x26b   : > { %v1974_v8 = vpop.eup %1973  ;;  %v754_v55 = vmul.f32 1.442695, %v745_v51 }
 0x26c   : > { %1302 = vmax.xlane.f32.xlu1 %v1301_v1  ;;  %736 = vmax.xlane.f32.xlu0 %v735_v3  ;;  %v542_v10 = vmul.f32 %v1974_v8, %v2525_v9  ;;  %v741_v9 = vsel %vm461_vm3, %v2557_v35, -inf  ;;  %v2627_v28 = vpop.eup %1975 }
 0x26d   : > { %v525_v34 = vsel %vm461_vm3, %v2627_v28, 0.0  ;;  %v2643_v19 = vpop.eup %1977  ;;  %1981 = vpow2.f32 %v754_v55 }
 0x26e   : > { %1766 = vmatmul.msk.f32.vlgmr.msra.gmra.mxu0 %vm461_vm3, %v542_v10  ;;  %v531_v52 = vsel %vm461_vm3, %v2643_v19, 0.0  ;;  %v2650_v53 = vpop.eup %1979 }
 0x26f   : > { %v768_v30 = vsel %vm461_vm3, %v2650_v53, 0.0 }
 0x272   : > { %v521_v4 = vpop.xlane.xlu1 %520 }
 0x273   : > { %v2656_v57 = vpop.eup %1981 }
 0x274   : > { %739 = vmax.xlane.f32.xlu0 %v738_v47  ;;  %v771_v60 = vsel %vm461_vm3, %v2656_v57, 0.0 }
 0x27c   : > { %1029 = vmax.xlane.f32.xlu0 %v1028_v14 }
 0x284   : > { %742 = vmax.xlane.f32.xlu0 %v741_v9 }
 0x28c   : > { %1293 = vmax.xlane.f32.xlu0 %v1292_v31 }
 0x28e   : > { %526 = vadd.xlane.f32.xlu2 %v525_v34 }
 0x294   : > { %1305 = vmax.xlane.f32.xlu0 %v1304_v40 }
 0x296   : > { %1026 = vmax.xlane.f32.xlu2 %v1025_v41 }
 0x29c   : > { %1311 = vmax.xlane.f32.xlu0 %v1310_v6 }
 0x29e   : > { %532 = vadd.xlane.f32.xlu2 %v531_v52 }
 0x2a4   : > { %769 = vadd.xlane.f32.xlu0 %v768_v30 }
 0x2a6   : > { %1299 = vmax.xlane.f32.xlu2 %v1298_v39 }
 0x2a7   : > { %v1012_v12 = vpop.xlane.xlu0 %1011 }
 0x2a8   : > { %v1034_v18 = vsub.f32 %v2546_v23, %v1012_v12 }
 0x2aa   : > { %v1042_v31 = vmul.f32 1.442695, %v1034_v18 }
 0x2ac   : > { %772 = vadd.xlane.f32.xlu0 %v771_v60 }
 0x2ae   : > { %1308 = vmax.xlane.f32.xlu2 %v1307_v61 }
 0x2af   : > { %v2662_v63 = vpop.xlane.xlu0 %1014 }
 0x2b7   : > { %v728_v5 = vpop.xlane.xlu0 %727  ;;  %v2664_v7 = vpop.xlane.xlu2 %1017 }
 0x2b8   : > { %v746_v1 = vsub.f32 %v2538_v20, %v728_v5 }
 0x2ba   : > { %v756_v3 = vmul.f32 1.442695, %v746_v1 }
 0x2bc   : > { %1983 = vpow2.f32 %v756_v3 }
 0x2bf   : > { %v518_v8 = vpop.xlane.xlu0 %517  ;;  %v2667_v10 = vpop.xlane.xlu1 %1020 }
 0x2c0   : > { %v731_v47 = vpop.xlane.xlu2 %730 }
 0x2c1   : > { %v747_v14 = vsub.f32 %v2540_v21, %v731_v47 }
 0x2c2   : > { %v2670_v15 = vpop.eup %1983 }
 0x2c3   : > { %v758_v9 = vmul.f32 1.442695, %v747_v14  ;;  %v774_v27 = vsel %vm461_vm3, %v2670_v15, 0.0 }
 0x2c4   : > { %775 = vadd.xlane.f32.xlu0 %v774_v27 }
 0x2c5   : > { %1985 = vpow2.f32 %v758_v9 }
 0x2c7   : > { %v734_v20 = vpop.xlane.xlu1 %733  ;;  %v515_v32 = vpop.xlane.xlu0 %514 }
 0x2c8   : > { %v748_v34 = vsub.f32 %v2542_v22, %v734_v20  ;;  %1987 = vrcp.f32 %v515_v32  ;;  %v1912_v36 = vpop.permute.xlu2 %1911 }
 0x2c9   : > { %v1913_v38 = vunpack.i.l.bf16 %v1912_v36  ;;  %1989 = vpow2.f32 %v1042_v31  ;;  %v1914_v40 = vunpack.i.h.bf16 %v1912_v36 }
 0x2ca   : > { %v760_v16 = vmul.f32 1.442695, %v748_v34 }
 0x2cb   : > { %v2676_v21 = vpop.eup %1985  ;;  %1156 = vmatpush.msrb.mxu0 %v1913_v38 }
 0x2cc   : > { %1991 = vpow2.f32 %v760_v16  ;;  %v777_v23 = vsel %vm461_vm3, %v2676_v21, 0.0  ;;  %v1036_v16 = vsub.f32 %v2560_v37, %v2664_v7 }
 0x2cd   : > { %778 = vadd.xlane.f32.xlu1 %v777_v23  ;;  %1157 = vmatpush.msrb.mxu0 %v1914_v40  ;;  %1993 = vrcp.f32 %v518_v8 }
 0x2ce   : > { %v1988_v41 = vpop.eup %1987  ;;  %1995 = vrcp.f32 %v521_v4  ;;  %v1046_v40 = vmul.f32 1.442695, %v1036_v16 }
 0x2cf   : > { %v524_v43 = vpop.xlane.xlu0 %523  ;;  %v543_v22 = vmul.f32 %v1988_v41, %v2580_v56  ;;  %v2681_v42 = vpop.eup %1989 }
 0x2d0   : > { %v1058_v55 = vsel %vm461_vm3, %v2681_v42, 0.0  ;;  %1997 = vrcp.f32 %v524_v43  ;;  %v530_v3 = vpop.xlane.xlu1 %529 }
 0x2d1   : > { %1767 = vmatmul.msk.f32.gmra.mxu0 %vm461_vm3, %v543_v22 }
 0x2d2   : > { %v2684_v51 = vpop.eup %1991 }
 0x2d3   : > { %v780_v6 = vsel %vm461_vm3, %v2684_v51, 0.0  ;;  %v1994_v52 = vpop.eup %1993 }
 0x2d4   : > { %781 = vadd.xlane.f32.xlu0 %v780_v6  ;;  %v544_v56 = vmul.f32 %v1994_v52, %v2566_v45  ;;  %v1996_v39 = vpop.eup %1995 }
 0x2d5   : > { %1059 = vadd.xlane.f32.xlu1 %v1058_v55  ;;  %v545_v60 = vmul.f32 %v1996_v39, %v2534_v17  ;;  %v1035_v17 = vsub.f32 %v2553_v29, %v2662_v63 }
 0x2d6   : > { %v1998_v1 = vpop.eup %1997 }
 0x2d7   : > { %v2690_v30 = vpop.xlane.xlu0 %1023  ;;  %v546_v8 = vmul.f32 %v1998_v1, %v2588_v59  ;;  %v1044_v18 = vmul.f32 1.442695, %v1035_v17  ;;  %v2708_v59 = vpop.f32.mrf.mxu1 }
 0x2d8   : > { %v1297_v27 = vpop.xlane.xlu1 %1296  ;;  %v1313_v29 = vsel %vm461_vm3, %v2708_v59, -inf }
 0x2d9   : > { %1768 = vmatmul.msk.f32.gmra.mxu0 %vm461_vm3, %v544_v56  ;;  %v1317_v31 = vsub.f32 %v2586_v58, %v1297_v27 }
 0x2db   : > { %v1326_v63 = vmul.f32 1.442695, %v1317_v31 }
 0x2df   : > { %v737_v12 = vpop.xlane.xlu0 %736 }
 0x2e0   : > { %v749_v61 = vsub.f32 %v2544_v24, %v737_v12  ;;  %v1303_v56 = vpop.xlane.xlu1 %1302 }
 0x2e1   : > { %1769 = vmatmul.msk.f32.gmra.mxu0 %vm461_vm3, %v545_v60 }
 0x2e2   : > { %v762_v5 = vmul.f32 1.442695, %v749_v61 }
 0x2e4   : > { %1999 = vpow2.f32 %v762_v5 }
 0x2e7   : > { %v740_v4 = vpop.xlane.xlu0 %739 }
 0x2e8   : > { %v750_v45 = vsub.f32 %v2550_v26, %v740_v4 }
 0x2e9   : > { %1770 = vmatmul.msk.f32.gmra.mxu0 %vm461_vm3, %v546_v8 }
 0x2ea   : > { %v764_v47 = vmul.f32 1.442695, %v750_v45  ;;  %v2700_v14 = vpop.eup %1999 }
 0x2eb   : > { %v783_v24 = vsel %vm461_vm3, %v2700_v14, 0.0 }
 0x2ec   : > { %2001 = vpow2.f32 %v764_v47  ;;  %784 = vadd.xlane.f32.xlu2 %v783_v24 }
 0x2ed   : > { %2003 = vpow2.f32 %v1044_v18 }
 0x2ee   : > { %2005 = vpow2.f32 %v1326_v63 }
 0x2ef   : > { %v2706_v9 = vpop.xlane.xlu0 %1029 }
 0x2f2   : > { %v2710_v26 = vpop.eup %2001 }
 0x2f3   : > { %v786_v20 = vsel %vm461_vm3, %v2710_v26, 0.0  ;;  %v2718_v36 = vpop.eup %2003 }
 0x2f4   : > { %787 = vadd.xlane.f32.xlu1 %v786_v20  ;;  %1314 = vmax.xlane.f32.xlu2 %v1313_v29  ;;  %v1061_v58 = vsel %vm461_vm3, %v2718_v36, 0.0  ;;  %v2726_v41 = vpop.eup %2005 }
 0x2f5   : > { %v1343_v7 = vsel %vm461_vm3, %v2726_v41, 0.0 }
 0x2f7   : > { %v743_v32 = vpop.xlane.xlu0 %742 }
 0x2f8   : > { %v751_v34 = vsub.f32 %v2557_v35, %v743_v32  ;;  %v1037_v35 = vsub.f32 %v2572_v49, %v2667_v10  ;;  %v1319_v49 = vsub.f32 %v2606_v62, %v1303_v56 }
 0x2fa   : > { %v766_v38 = vmul.f32 1.442695, %v751_v34  ;;  %v1048_v6 = vmul.f32 1.442695, %v1037_v35  ;;  %v1330_v5 = vmul.f32 1.442695, %v1319_v49  ;;  %v1038_v35 = vsub.f32 %v2598_v2, %v2690_v30 }
 0x2fc   : > { %2007 = vpow2.f32 %v766_v38  ;;  %1062 = vadd.xlane.f32.xlu2 %v1061_v58 }
 0x2ff   : > { %v2724_v23 = vpop.xlane.xlu0 %1293 }
 0x300   : > { %v1316_v38 = vsub.f32 %v2570_v48, %v2724_v23 }
 0x301   : > { %v527_v43 = vpop.xlane.xlu2 %526 }
 0x302   : > { %v2728_v22 = vpop.eup %2007  ;;  %2009 = vrcp.f32 %v527_v43 }
 0x303   : > { %2011 = vpow2.f32 %v1046_v40  ;;  %v789_v37 = vsel %vm461_vm3, %v2728_v22, 0.0  ;;  %v1324_v40 = vmul.f32 1.442695, %v1316_v38 }
 0x304   : > { %790 = vadd.xlane.f32.xlu0 %v789_v37  ;;  %1344 = vadd.xlane.f32.xlu2 %v1343_v7  ;;  %2013 = vrcp.f32 %v530_v3  ;;  %v1050_v37 = vmul.f32 1.442695, %v1038_v35 }
 0x305   : > { %2015 = vpow2.f32 %v1048_v6  ;;  %v2793_v6 = vpop.f32.mrf.mxu3 }
 0x307   : > { %v1306_v52 = vpop.xlane.xlu0 %1305 }
 0x308   : > { %v2010_v55 = vpop.eup %2009  ;;  %v1320_v62 = vsub.f32 %v2625_v25, %v1306_v52 }
 0x309   : > { %v2736_v39 = vpop.eup %2011  ;;  %v2738_v12 = vpop.xlane.xlu2 %1026  ;;  %v547_v60 = vmul.f32 %v2010_v55, %v2627_v28 }
 0x30a   : > { %v1064_v10 = vsel %vm461_vm3, %v2736_v39, 0.0  ;;  %v2014_v61 = vpop.eup %2013  ;;  %v1039_v52 = vsub.f32 %v2613_v11, %v2738_v12 }
 0x30b   : > { %1771 = vmatmul.msk.f32.gmra.mxu0 %vm461_vm3, %v547_v60  ;;  %v2749_v3 = vpop.eup %2015  ;;  %v548_v28 = vmul.f32 %v2014_v61, %v2590_v44  ;;  %v1031_v60 = vsel %vm461_vm3, %v2793_v6, -inf }
 0x30c   : > { %1065 = vadd.xlane.f32.xlu2 %v1064_v10  ;;  %v1067_v8 = vsel %vm461_vm3, %v2749_v3, 0.0  ;;  %v1052_v2 = vmul.f32 1.442695, %v1039_v52 }
 0x30d   : > { %1921 = vrot.lane.b32.xlu1 %v2350_v50, %s2099_s27  ;;  %v1332_v50 = vmul.f32 1.442695, %v1320_v62 }
 0x30f   : > { %v2747_v1 = vpop.xlane.xlu0 %1311 }
 0x311   : > { %v533_v4 = vpop.xlane.xlu2 %532 }
 0x312   : > { %2017 = vrcp.f32 %v533_v4 }
 0x313   : > { %2019 = vpow2.f32 %v1330_v5  ;;  %1772 = vmatmul.msk.f32.gmra.mxu0 %vm461_vm3, %v548_v28 }
 0x314   : > { %1068 = vadd.xlane.f32.xlu2 %v1067_v8 }
 0x317   : > { %v770_v45 = vpop.xlane.xlu0 %769 }
 0x318   : > { %v2018_v47 = vpop.eup %2017  ;;  %2021 = vrcp.f32 %v770_v45  ;;  %1916 = vrot.lane.b32.xlu0 %v2360_v54, %s2098_s26 }
 0x319   : > { %v2758_v17 = vpop.eup %2019  ;;  %v2760_v44 = vpop.xlane.xlu2 %1299  ;;  %v549_v24 = vmul.f32 %v2018_v47, %v2643_v19  ;;  %2023 = vpow2.f32 %v1332_v50  ;;  %v1040_v19 = vsub.f32 %v2618_v13, %v2706_v9 }
 0x31a   : > { %v1349_v25 = vsel %vm461_vm3, %v2758_v17, 0.0  ;;  %v1318_v50 = vsub.f32 %v2596_v0, %v2760_v44 }
 0x31b   : > { %1773 = vmatmul.msk.f32.gmra.mxu0 %vm461_vm3, %v549_v24  ;;  %v1054_v58 = vmul.f32 1.442695, %v1040_v19 }
 0x31c   : > { %1350 = vadd.xlane.f32.xlu2 %v1349_v25  ;;  %v1328_v24 = vmul.f32 1.442695, %v1318_v50 }
 0x31e   : > { %v2022_v18 = vpop.eup %2021 }
 0x31f   : > { %v773_v27 = vpop.xlane.xlu0 %772  ;;  %v800_v31 = vmul.f32 %v2022_v18, %v2650_v53  ;;  %v2767_v20 = vpop.eup %2023  ;;  %v1322_v18 = vsub.f32 %v2641_v46, %v2747_v1 }
 0x320   : > { %2025 = vrcp.f32 %v773_v27  ;;  %v1352_v34 = vsel %vm461_vm3, %v2767_v20, 0.0 }
 0x321   : > { %v1309_v29 = vpop.xlane.xlu2 %1308  ;;  %1790 = vmatmul.msk.f32.vlgmr.msrb.gmra.mxu2 %vm461_vm3, %v800_v31  ;;  %v1336_v44 = vmul.f32 1.442695, %v1322_v18 }
 0x322   : > { %v1321_v63 = vsub.f32 %v2634_v33, %v1309_v29 }
 0x324   : > { %v1334_v32 = vmul.f32 1.442695, %v1321_v63  ;;  %1353 = vadd.xlane.f32.xlu2 %v1352_v34 }
 0x326   : > { %v2026_v53 = vpop.eup %2025  ;;  %2027 = vpow2.f32 %v1334_v32 }
 0x327   : > { %v801_v16 = vmul.f32 %v2026_v53, %v2656_v57  ;;  %2029 = vpow2.f32 %v1054_v58 }
 0x328   : > { %2031 = vpow2.f32 %v1324_v40 }
 0x329   : > { %1791 = vmatmul.msk.f32.gmra.mxu2 %vm461_vm3, %v801_v16 }
 0x32c   : > { %v2779_v33 = vpop.eup %2027 }
 0x32d   : > { %v1355_v13 = vsel %vm461_vm3, %v2779_v33, 0.0  ;;  %v2783_v9 = vpop.eup %2029 }
 0x32e   : > { %1356 = vadd.xlane.f32.xlu2 %v1355_v13  ;;  %v2785_v48 = vpop.eup %2031  ;;  %v1076_v23 = vsel %vm461_vm3, %v2783_v9, 0.0 }
 0x32f   : > { %v1340_v57 = vsel %vm461_vm3, %v2785_v48, 0.0 }
 0x336   : > { %1077 = vadd.xlane.f32.xlu2 %v1076_v23 }
 0x337   : > { %v776_v43 = vpop.xlane.xlu0 %775  ;;  %1341 = vadd.xlane.f32.xlu1 %v1340_v57 }
 0x338   : > { %2033 = vrcp.f32 %v776_v43 }
 0x339   : > { %2035 = vpow2.f32 %v1050_v37 }
 0x33e   : > { %v2034_v7 = vpop.eup %2033 }
 0x33f   : > { %v802_v55 = vmul.f32 %v2034_v7, %v2670_v15  ;;  %v2801_v30 = vpop.eup %2035 }
 0x340   : > { %v779_v56 = vpop.xlane.xlu1 %778  ;;  %v1070_v15 = vsel %vm461_vm3, %v2801_v30, 0.0 }
 0x341   : > { %2037 = vrcp.f32 %v779_v56  ;;  %1792 = vmatmul.msk.f32.gmra.mxu2 %vm461_vm3, %v802_v55 }
 0x342   : > { %1032 = vmax.xlane.f32.xlu0 %v1031_v60  ;;  %2039 = vpow2.f32 %v1052_v2 }
 0x347   : > { %v2038_v49 = vpop.eup %2037  ;;  %v782_v10 = vpop.xlane.xlu0 %781 }
 0x348   : > { %2041 = vrcp.f32 %v782_v10  ;;  %v803_v11 = vmul.f32 %v2038_v49, %v2676_v21  ;;  %v2807_v12 = vpop.eup %2039  ;;  %v2815_v21 = vpop.xlane.xlu1 %1059 }
 0x349   : > { %v1073_v4 = vsel %vm461_vm3, %v2807_v12, 0.0 }
 0x34a   : > { %1793 = vmatmul.msk.f32.gmra.mxu2 %vm461_vm3, %v803_v11  ;;  %1071 = vadd.xlane.f32.xlu0 %v1070_v15 }
 0x34e   : > { %v2042_v61 = vpop.eup %2041 }
 0x34f   : > { %v804_v5 = vmul.f32 %v2042_v61, %v2684_v51 }
 0x350   : > { %1926 = vrot.lane.b32.xlu1 %v2360_v54, %s2099_s27 }
 0x352   : > { %1794 = vmatmul.msk.f32.gmra.mxu2 %vm461_vm3, %v804_v5  ;;  %1074 = vadd.xlane.f32.xlu0 %v1073_v4 }
 0x35f   : > { %v785_v28 = vpop.xlane.xlu2 %784 }
 0x360   : > { %2043 = vrcp.f32 %v785_v28 }
 0x366   : > { %v2044_v62 = vpop.eup %2043 }
 0x367   : > { %v788_v8 = vpop.xlane.xlu1 %787  ;;  %v1315_v51 = vpop.xlane.xlu2 %1314  ;;  %v805_v45 = vmul.f32 %v2044_v62, %v2700_v14 }
 0x368   : > { %2045 = vrcp.f32 %v788_v8  ;;  %v1323_v54 = vsub.f32 %v2708_v59, %v1315_v51 }
 0x369   : > { %1795 = vmatmul.msk.f32.gmra.mxu2 %vm461_vm3, %v805_v45 }
 0x36a   : > { %v1338_v47 = vmul.f32 1.442695, %v1323_v54 }
 0x36c   : > { %2047 = vpow2.f32 %v1338_v47 }
 0x36d   : > { %2049 = vpow2.f32 %v1328_v24 }
 0x36e   : > { %v2046_v25 = vpop.eup %2045  ;;  %2051 = vpow2.f32 %v1336_v44 }
 0x36f   : > { %v806_v27 = vmul.f32 %v2046_v25, %v2710_v26  ;;  %v1063_v58 = vpop.xlane.xlu2 %1062 }
 0x371   : > { %1796 = vmatmul.msk.f32.gmra.mxu2 %vm461_vm3, %v806_v27 }
 0x372   : > { %v2826_v0 = vpop.eup %2047 }
 0x373   : > { %v1361_v14 = vsel %vm461_vm3, %v2826_v0, 0.0  ;;  %v2830_v59 = vpop.eup %2049 }
 0x374   : > { %1362 = vadd.xlane.f32.xlu0 %v1361_v14  ;;  %v1346_v46 = vsel %vm461_vm3, %v2830_v59, 0.0  ;;  %v2834_v26 = vpop.eup %2051 }
 0x375   : > { %v1358_v32 = vsel %vm461_vm3, %v2834_v26, 0.0 }
 0x377   : > { %v791_v31 = vpop.xlane.xlu0 %790  ;;  %v1345_v57 = vpop.xlane.xlu2 %1344 }
 0x378   : > { %2053 = vrcp.f32 %v791_v31 }
 0x37a   : > { %1347 = vadd.xlane.f32.xlu1 %v1346_v46 }
 0x37e   : > { %v2054_v1 = vpop.eup %2053 }
 0x37f   : > { %v1922_v29 = vpop.permute.xlu1 %1921  ;;  %v807_v63 = vmul.f32 %v2054_v1, %v2728_v22  ;;  %v1066_v55 = vpop.xlane.xlu2 %1065 }
 0x380   : > { %v1923_v19 = vunpack.i.l.bf16 %v1922_v29  ;;  %v1924_v34 = vunpack.i.h.bf16 %v1922_v29  ;;  %v2873_v1 = vpop.f32.mrf.mxu0 }
 0x381   : > { %1797 = vmatmul.msk.f32.gmra.mxu2 %vm461_vm3, %v807_v63 }
 0x382   : > { %1359 = vadd.xlane.f32.xlu1 %v1358_v32  ;;  %1158 = vmatpush.msrb.mxu0 %v1923_v19 }
 0x384   : > { %1159 = vmatpush.msrb.mxu0 %v1924_v34 }
 0x387   : > { %v1069_v49 = vpop.xlane.xlu2 %1068 }
 0x388   : > { %v2877_v63 = vpop.f32.mrf.mxu0 }
 0x38a   : > { %v1917_v38 = vpop.permute.xlu0 %1916 }
 0x38b   : > { %v1918_v53 = vunpack.i.l.bf16 %v1917_v38  ;;  %v1919_v16 = vunpack.i.h.bf16 %v1917_v38 }
 0x38d   : > { %1442 = vmatpush.msra.mxu2 %v1918_v53 }
 0x38f   : > { %1443 = vmatpush.msra.mxu2 %v1919_v16  ;;  %v1351_v4 = vpop.xlane.xlu2 %1350 }
 0x390   : > { %v2881_v32 = vpop.f32.mrf.mxu0 }
 0x397   : > { %v1354_v50 = vpop.xlane.xlu2 %1353 }
 0x3a1   : > { %v1357_v47 = vpop.xlane.xlu2 %1356 }
 0x3a4   : > { %v881_v40 = vpop.f32.mrf.mxu2 }
 0x3a9   : > { %v1078_v18 = vpop.xlane.xlu2 %1077 }
 0x3aa   : > { %v1342_v13 = vpop.xlane.xlu1 %1341 }
 0x3ab   : > { %2055 = vrcp.f32 %v1342_v13 }
 0x3ac   : > { %v884_v22 = vpop.f32.mrf.mxu2  ;;  %2057 = vrcp.f32 %v1345_v57 }
 0x3ad   : > { %v1930_v23 = vpack.i.bf16 %v884_v22, %v881_v40 }
 0x3af   : > { %1931 = vrot.lane.b32.xlu2 %v1930_v23, %s2098_s26 }
 0x3b1   : > { %v2056_v43 = vpop.eup %2055 }
 0x3b2   : > { %v1372_v35 = vmul.f32 %v2056_v43, %v2785_v48  ;;  %v2058_v52 = vpop.eup %2057 }
 0x3b3   : > { %v1373_v60 = vmul.f32 %v2058_v52, %v2726_v41 }
 0x3b4   : > { %1838 = vmatmul.msk.f32.vlgmr.msra.gmra.mxu2 %vm461_vm3, %v1372_v35 }
 0x3b5   : > { %v1033_v37 = vpop.xlane.xlu0 %1032 }
 0x3b6   : > { %v1041_v7 = vsub.f32 %v2793_v6, %v1033_v37 }
 0x3b8   : > { %v1056_v56 = vmul.f32 1.442695, %v1041_v7 }
 0x3ba   : > { %2059 = vpow2.f32 %v1056_v56 }
 0x3bb   : > { %2061 = vrcp.f32 %v2815_v21 }
 0x3bc   : > { %1839 = vmatmul.msk.f32.gmra.mxu2 %vm461_vm3, %v1373_v60  ;;  %2063 = vrcp.f32 %v1063_v58  ;;  %v2886_v58 = vpop.f32.mrf.mxu0 }
 0x3bd   : > { %2065 = vrcp.f32 %v1066_v55  ;;  %v1072_v51 = vpop.xlane.xlu0 %1071 }
 0x3be   : > { %2067 = vrcp.f32 %v1069_v49 }
 0x3bf   : > { %2069 = vrcp.f32 %v1072_v51  ;;  %v1599_v51 = vld [vmem:[%s3022_s2 + $0x48] sm:$0xff] }
 0x3c0   : > { %v2847_v2 = vpop.eup %2059 }
 0x3c1   : > { %v1079_v48 = vsel %vm461_vm3, %v2847_v2, 0.0  ;;  %v2062_v11 = vpop.eup %2061 }
 0x3c2   : > { %v1927_v10 = vpop.permute.xlu1 %1926  ;;  %1080 = vadd.xlane.f32.xlu1 %v1079_v48  ;;  %v1090_v41 = vmul.f32 %v2062_v11, %v2681_v42  ;;  %v2064_v5 = vpop.eup %2063 }
 0x3c3   : > { %v1928_v6 = vunpack.i.l.bf16 %v1927_v10  ;;  %v1929_v61 = vunpack.i.h.bf16 %v1927_v10  ;;  %v1091_v62 = vmul.f32 %v2064_v5, %v2718_v36  ;;  %v2066_v8 = vpop.eup %2065 }
 0x3c4   : > { %v2851_v15 = vpop.f32.mrf.mxu2  ;;  %v1092_v42 = vmul.f32 %v2066_v8, %v2736_v39  ;;  %v2068_v45 = vpop.eup %2067  ;;  %v1601_v8 = vld [vmem:[%s3022_s2 + $0x58] sm:$0xff] }
 0x3c5   : > { %1160 = vmatpush.msrb.mxu0 %v1928_v6  ;;  %v1093_v54 = vmul.f32 %v2068_v45, %v2749_v3  ;;  %v1075_v24 = vpop.xlane.xlu0 %1074  ;;  %v2070_v25 = vpop.eup %2069 }
 0x3c6   : > { %2071 = vrcp.f32 %v1075_v24  ;;  %v1094_v36 = vmul.f32 %v2070_v25, %v2801_v30  ;;  %v2891_v22 = vpop.f32.mrf.mxu0  ;;  %v1596_v24 = vld [vmem:[%s3022_s2 + $0x30] sm:$0xff] }
 0x3c7   : > { %1161 = vmatpush.msrb.mxu0 %v1929_v61  ;;  %2073 = vrcp.f32 %v1078_v18  ;;  %v1594_v18 = vld [vmem:[%s3022_s2 + $0x20] sm:$0xff] }
 0x3c8   : > { %1814 = vmatmul.msk.f32.vlgmr.msrb.gmra.mxu0 %vm461_vm3, %v1090_v41 }
 0x3cc   : > { %v2072_v27 = vpop.eup %2071 }
 0x3cd   : > { %v2855_v21 = vpop.f32.mrf.mxu2  ;;  %v1095_v44 = vmul.f32 %v2072_v27, %v2807_v12  ;;  %v2074_v3 = vpop.eup %2073  ;;  %v1593_v27 = vld [vmem:[%s3022_s2 + $0x18] sm:$0xff] }
 0x3ce   : > { %v1945_v28 = vpack.i.bf16 %v2855_v21, %v2851_v15  ;;  %v1096_v46 = vmul.f32 %v2074_v3, %v2783_v9  ;;  %v2893_v23 = vpop.f32.mrf.mxu0  ;;  %v1605_v15 = vld [vmem:[%s3022_s2 + $0x78] sm:$0xff]  ;;  %v1604_v21 = vld [vmem:[%s3022_s2 + $0x70] sm:$0xff]  ;;  %v1591_v3 = vld [vmem:[%s3022_s2 + $0x8] sm:$0xff] }
 0x3cf   : > { %1610 = vmatpush.msra.mxu3 %v1605_v15 }
 0x3d0   : > { %1815 = vmatmul.msk.f32.gmra.mxu0 %vm461_vm3, %v1091_v62  ;;  %v1602_v62 = vld [vmem:[%s3022_s2 + $0x60] sm:$0xff] }
 0x3d1   : > { %1611 = vmatpush.msra.mxu3 %v1604_v21 }
 0x3d5   : > { %v893_v53 = vpop.f32.mrf.mxu2 }
 0x3d6   : > { %v2895_v43 = vpop.f32.mrf.mxu0 }
 0x3d8   : > { %1816 = vmatmul.msk.f32.gmra.mxu0 %vm461_vm3, %v1092_v42  ;;  %v1600_v42 = vld [vmem:[%s3022_s2 + $0x50] sm:$0xff] }
 0x3de   : > { %v2897_v7 = vpop.f32.mrf.mxu0 }
 0x3e0   : > { %1817 = vmatmul.msk.f32.gmra.mxu0 %vm461_vm3, %v1093_v54  ;;  %v1598_v54 = vld [vmem:[%s3022_s2 + $0x40] sm:$0xff] }
 0x3e8   : > { %1818 = vmatmul.msk.f32.gmra.mxu0 %vm461_vm3, %v1094_v36  ;;  %v1595_v36 = vld [vmem:[%s3022_s2 + $0x28] sm:$0xff] }
 0x3ec   : > { %v896_v40 = vpop.f32.mrf.mxu2 }
 0x3ed   : > { %v1348_v39 = vpop.xlane.xlu1 %1347  ;;  %v1955_v60 = vpack.i.bf16 %v896_v40, %v893_v53 }
 0x3ee   : > { %2075 = vrcp.f32 %v1348_v39  ;;  %v1592_v39 = vld [vmem:[%s3022_s2 + $0x10] sm:$0xff] }
 0x3ef   : > { %2077 = vrcp.f32 %v1351_v4 }
 0x3f0   : > { %1819 = vmatmul.msk.f32.gmra.mxu0 %vm461_vm3, %v1095_v44  ;;  %2079 = vrcp.f32 %v1354_v50 }
 0x3f1   : > { %2081 = vrcp.f32 %v1357_v47  ;;  %v1597_v47 = vld [vmem:[%s3022_s2 + $0x38] sm:$0xff] }
 0x3f4   : > { %v2076_v14 = vpop.eup %2075 }
 0x3f5   : > { %v1374_v31 = vmul.f32 %v2076_v14, %v2830_v59  ;;  %v2078_v30 = vpop.eup %2077  ;;  %v1360_v9 = vpop.xlane.xlu1 %1359  ;;  %v1590_v14 = vld [vmem:[%s3022_s2] sm:$0xff] }
 0x3f6   : > { %v1375_v29 = vmul.f32 %v2078_v30, %v2758_v17  ;;  %v2080_v12 = vpop.eup %2079  ;;  %2083 = vrcp.f32 %v1360_v9  ;;  %v1363_v17 = vpop.xlane.xlu0 %1362 }
 0x3f7   : > { %1840 = vmatmul.msk.f32.gmra.mxu2 %vm461_vm3, %v1374_v31  ;;  %v1376_v59 = vmul.f32 %v2080_v12, %v2767_v20  ;;  %v2082_v19 = vpop.eup %2081  ;;  %2085 = vrcp.f32 %v1363_v17 }
 0x3f8   : > { %1820 = vmatmul.msk.f32.gmra.mxu0 %vm461_vm3, %v1096_v46  ;;  %v1377_v34 = vmul.f32 %v2082_v19, %v2779_v33  ;;  %v899_v33 = vpop.f32.mrf.mxu2 }
 0x3fc   : > { %v2084_v38 = vpop.eup %2083 }
 0x3fd   : > { %v1378_v16 = vmul.f32 %v2084_v38, %v2834_v26  ;;  %v2086_v20 = vpop.eup %2085 }
 0x3fe   : > { %v1379_v13 = vmul.f32 %v2086_v20, %v2826_v0 }
 0x3ff   : > { %1841 = vmatmul.msk.f32.gmra.mxu2 %vm461_vm3, %v1375_v29 }
 0x404   : > { %v902_v57 = vpop.f32.mrf.mxu2 }
 0x407   : > { %1842 = vmatmul.msk.f32.gmra.mxu2 %vm461_vm3, %v1376_v59 }
 0x409   : > { %v1932_v46 = vpop.permute.xlu2 %1931 }
 0x40a   : > { %v1933_v30 = vunpack.i.l.bf16 %v1932_v46  ;;  %v1934_v17 = vunpack.i.h.bf16 %v1932_v46 }
 0x40c   : > { %v1565_v9 = vsel %vm371_vm2, %v2873_v1, %v1933_v30 }
 0x40f   : > { %1843 = vmatmul.msk.f32.gmra.mxu2 %vm461_vm3, %v1377_v34 }
 0x417   : > { %1844 = vmatmul.msk.f32.gmra.mxu2 %vm461_vm3, %v1378_v16  ;;  %v1566_v16 = vsel %vm371_vm2, %v2877_v63, %v1934_v17 }
 0x41f   : > { %1845 = vmatmul.msk.f32.gmra.mxu2 %vm461_vm3, %v1379_v13 }
 0x435   : > { %v1081_v35 = vpop.xlane.xlu1 %1080 }
 0x436   : > { %2087 = vrcp.f32 %v1081_v35 }
 0x437   : > { %v1445_v26 = vpop.f32.mrf.mxu2 }
 0x43c   : > { %v2088_v37 = vpop.eup %2087 }
 0x43d   : > { %v1097_v52 = vmul.f32 %v2088_v37, %v2847_v2 }
 0x43f   : > { %1821 = vmatmul.msk.f32.gmra.mxu0 %vm461_vm3, %v1097_v52  ;;  %v1448_v0 = vpop.f32.mrf.mxu2 }
 0x440   : > { %v1940_v55 = vpack.i.bf16 %v1448_v0, %v1445_v26 }
 0x442   : > { %1941 = vrot.lane.b32.xlu1 %v1940_v55, %s2097_s25 }
 0x445   : > { %v1163_v56 = vpop.f32.mrf.mxu0 }
 0x44a   : > { %1956 = vrot.lane.b32.xlu1 %v1955_v60, %s2098_s26 }
 0x44d   : > { %v1166_v48 = vpop.f32.mrf.mxu0 }
 0x44e   : > { %v1935_v49 = vpack.i.bf16 %v1166_v48, %v1163_v56 }
 0x450   : > { %1936 = vrot.lane.b32.xlu0 %v1935_v49, %s2099_s27 }
 0x455   : > { %v1169_v10 = vpop.f32.mrf.mxu0 }
 0x458   : > { %1946 = vrot.lane.b32.xlu0 %v1945_v28, %s2098_s26  ;;  %v1603_v28 = vld [vmem:[%s3022_s2 + $0x68] sm:$0xff] }
 0x459   : > { %1612 = vmatpush.msra.mxu3 %v1603_v28 }
 0x45b   : > { %1613 = vmatpush.msra.mxu3 %v1602_v62 }
 0x45d   : > { %v1172_v2 = vpop.f32.mrf.mxu0  ;;  %1614 = vmatpush.msra.mxu3 %v1601_v8 }
 0x45e   : > { %v1950_v11 = vpack.i.bf16 %v1172_v2, %v1169_v10 }
 0x45f   : > { %1615 = vmatpush.msra.mxu3 %v1600_v42 }
 0x460   : > { %1951 = vrot.lane.b32.xlu2 %v1950_v11, %s2099_s27 }
 0x461   : > { %1616 = vmatpush.msra.mxu3 %v1599_v51 }
 0x463   : > { %1617 = vmatpush.msra.mxu3 %v1598_v54 }
 0x465   : > { %v1175_v6 = vpop.f32.mrf.mxu0  ;;  %1618 = vmatpush.msra.mxu3 %v1597_v47 }
 0x467   : > { %1619 = vmatpush.msra.mxu3 %v1596_v24 }
 0x469   : > { %1620 = vmatpush.msra.mxu3 %v1595_v36 }
 0x46b   : > { %1621 = vmatpush.msra.mxu3 %v1594_v18 }
 0x46d   : > { %v1178_v61 = vpop.f32.mrf.mxu0  ;;  %1622 = vmatpush.msra.mxu3 %v1593_v27 }
 0x46e   : > { %1519 = vrot.lane.b32.xlu1 %v1178_v61, %s2099_s27 }
 0x46f   : > { %1623 = vmatpush.msra.mxu3 %v1592_v39 }
 0x471   : > { %1624 = vmatpush.msra.mxu3 %v1591_v3 }
 0x473   : > { %1625 = vmatpush.msra.mxu3 %v1590_v14 }
 0x475   : > { %v1181_v41 = vpop.f32.mrf.mxu0 }
 0x476   : > { %1521 = vrot.lane.b32.xlu1 %v1181_v41, %s2099_s27 }
 0x47a   : > { %v1451_v5 = vpop.f32.mrf.mxu2 }
 0x47b   : > { %1545 = vrot.lane.b32.xlu0 %v1451_v5, %s2097_s25 }
 0x482   : > { %v1454_v4 = vpop.f32.mrf.mxu2 }
 0x483   : > { %1547 = vrot.lane.b32.xlu2 %v1454_v4, %s2097_s25  ;;  %1517 = vrot.lane.b32.xlu0 %v1175_v6, %s2099_s27 }
 0x48a   : > { %v1457_v50 = vpop.f32.mrf.mxu2 }
 0x48b   : > { %1549 = vrot.lane.b32.xlu2 %v1457_v50, %s2097_s25 }
 0x492   : > { %v1460_v45 = vpop.f32.mrf.mxu2 }
 0x493   : > { %1489 = vrot.lane.b32.xlu2 %v899_v33, %s2098_s26  ;;  %1551 = vrot.lane.b32.xlu0 %v1460_v45, %s2097_s25 }
 0x49a   : > { %v1463_v25 = vpop.f32.mrf.mxu2 }
 0x49b   : > { %1491 = vrot.lane.b32.xlu2 %v902_v57, %s2098_s26  ;;  %1553 = vrot.lane.b32.xlu0 %v1463_v25, %s2097_s25 }
 0x4a2   : > { %v1466_v44 = vpop.f32.mrf.mxu2 }
 0x4a3   : > { %1555 = vrot.lane.b32.xlu0 %v1466_v44, %s2097_s25 }
 0x4b4   : > { %v1942_v29 = vpop.permute.xlu1 %1941 }
 0x4b5   : > { %v1943_v19 = vunpack.i.l.bf16 %v1942_v29  ;;  %v1944_v40 = vunpack.i.h.bf16 %v1942_v29 }
 0x4ba   : > { %v1952_v1 = vpop.permute.xlu2 %1951 }
 0x4bb   : > { %v1953_v26 = vunpack.i.l.bf16 %v1952_v1  ;;  %v1954_v56 = vunpack.i.h.bf16 %v1952_v1 }
 0x4bc   : > { %v1184_v31 = vpop.f32.mrf.mxu0  ;;  %v1957_v60 = vpop.permute.xlu1 %1956 }
 0x4bd   : > { %1523 = vrot.lane.b32.xlu1 %v1184_v31, %s2099_s27  ;;  %v1958_v10 = vunpack.i.l.bf16 %v1957_v60 }
 0x4bf   : > { %v1569_v11 = vsel %vm371_vm2, %v2891_v22, %v1958_v10 }
 0x4c2   : > { %v1937_v12 = vpop.permute.xlu0 %1936 }
 0x4c3   : > { %v1938_v59 = vunpack.i.l.bf16 %v1937_v12  ;;  %v1939_v53 = vunpack.i.h.bf16 %v1937_v12 }
 0x4c5   : > { %v1573_v34 = vsel %vm461_vm3, %v1565_v9, %v1938_v59  ;;  %v1574_v20 = vsel %vm461_vm3, %v1566_v16, %v1939_v53 }
 0x4c6   : > { %v1582_v38 = vsel %vm1581_vm4, %v1573_v34, %v1943_v19  ;;  %v1583_v13 = vsel %vm1581_vm4, %v1574_v20, %v1944_v40 }
 0x4c7   : > { %1626 = vmatmul.f32.vlgmr.msra.gmra.mxu3 %v1582_v38 }
 0x4ca   : > { %v1947_v33 = vpop.permute.xlu0 %1946 }
 0x4cb   : > { %v1948_v57 = vunpack.i.l.bf16 %v1947_v33  ;;  %v1949_v0 = vunpack.i.h.bf16 %v1947_v33 }
 0x4cd   : > { %v1567_v35 = vsel %vm371_vm2, %v2881_v32, %v1948_v57  ;;  %v1568_v63 = vsel %vm371_vm2, %v2886_v58, %v1949_v0  ;;  %v1959_v58 = vunpack.i.h.bf16 %v1957_v60 }
 0x4ce   : > { %v1575_v52 = vsel %vm461_vm3, %v1567_v35, %v1953_v26  ;;  %v1576_v49 = vsel %vm461_vm3, %v1568_v63, %v1954_v56 }
 0x4cf   : > { %1629 = vmatmul.f32.gmra.mxu3 %v1583_v13  ;;  %v1570_v4 = vsel %vm371_vm2, %v2893_v23, %v1959_v58 }
 0x4dd   : > { %v1548_v48 = vpop.permute.xlu2 %1547 }
 0x4de   : > { %v1585_v2 = vsel %vm1581_vm4, %v1576_v49, %v1548_v48 }
 0x4e0   : > { %v1520_v5 = vpop.permute.xlu1 %1519 }
 0x4e1   : > { %v1578_v15 = vsel %vm461_vm3, %v1570_v4, %v1520_v5 }
 0x4e5   : > { %v1550_v61 = vpop.permute.xlu2 %1549 }
 0x4e8   : > { %v1522_v8 = vpop.permute.xlu1 %1521 }
 0x4ed   : > { %v1546_v37 = vpop.permute.xlu0 %1545  ;;  %v1490_v62 = vpop.permute.xlu2 %1489 }
 0x4ee   : > { %v1584_v55 = vsel %vm1581_vm4, %v1575_v52, %v1546_v37  ;;  %v1571_v22 = vsel %vm371_vm2, %v2895_v43, %v1490_v62  ;;  %v1960_v43 = vld [vmem:[%s3023_s3] ss:$0 sm:$0xff] }
 0x4ef   : > { %1632 = vmatmul.f32.gmra.mxu3 %v1584_v55  ;;  %v1579_v42 = vsel %vm461_vm3, %v1571_v22, %v1522_v8 }
 0x4f5   : > { %v1518_v32 = vpop.permute.xlu0 %1517  ;;  %v1492_v45 = vpop.permute.xlu2 %1491 }
 0x4f6   : > { %v1577_v6 = vsel %vm461_vm3, %v1569_v11, %v1518_v32  ;;  %v1572_v23 = vsel %vm371_vm2, %v2897_v7, %v1492_v45 }
 0x4f7   : > { %1635 = vmatmul.f32.gmra.mxu3 %v1585_v2  ;;  %v1586_v41 = vsel %vm1581_vm4, %v1577_v6, %v1550_v61 }
 0x4ff   : > { %1638 = vmatmul.f32.gmra.mxu3 %v1586_v41 }
 0x505   : > { %v1552_v21 = vpop.permute.xlu0 %1551 }
 0x506   : > { %v1587_v28 = vsel %vm1581_vm4, %v1578_v15, %v1552_v21 }
 0x507   : > { %1641 = vmatmul.f32.gmra.mxu3 %v1587_v28 }
 0x50d   : > { %v1554_v50 = vpop.permute.xlu0 %1553 }
 0x50e   : > { %v1588_v51 = vsel %vm1581_vm4, %v1579_v42, %v1554_v50 }
 0x50f   : > { %1644 = vmatmul.f32.gmra.mxu3 %v1588_v51 }
 0x515   : > { %v1556_v47 = vpop.permute.xlu0 %1555 }
 0x52f   : > { %v1524_v54 = vpop.permute.xlu1 %1523 }
 0x530   : > { %v1580_v24 = vsel %vm461_vm3, %v1572_v23, %v1524_v54 }
 0x531   : > { %v1589_v25 = vsel %vm1581_vm4, %v1580_v24, %v1556_v47 }
 0x532   : > { %1647 = vmatmul.f32.gmra.mxu3 %v1589_v25 }
 0x54a   : > { %v1627_v36 = vpop.f32.mrf.mxu3 }
 0x54b   : > { %v1628_v18 = vadd.f32 %v1960_v43, %v1627_v36 }
 0x54d   : > { %1651 = vst.msk [vmem:[%s197_s17] sm:$0xff] %vm216_vm1, %v1628_v18 }
 0x552   : > { %v1630_v7 = vpop.f32.mrf.mxu3 }
 0x553   : > { %v1631_v27 = vadd.f32 %v1960_v43, %v1630_v7 }
 0x555   : > { %1652 = vst.msk [vmem:[%s197_s17 + $0x8] sm:$0xff] %vm216_vm1, %v1631_v27 }
 0x572   : > { %v1633_v39 = vpop.f32.mrf.mxu3 }
 0x573   : > { %v1634_v44 = vadd.f32 %v1960_v43, %v1633_v39 }
 0x575   : > { %1653 = vst.msk [vmem:[%s197_s17 + $0x10] sm:$0xff] %vm216_vm1, %v1634_v44 }
 0x57a   : > { %v1636_v3 = vpop.f32.mrf.mxu3 }
 0x57b   : > { %v1637_v14 = vadd.f32 %v1960_v43, %v1636_v3 }
 0x57d   : > { %1654 = vst.msk [vmem:[%s197_s17 + $0x18] sm:$0xff] %vm216_vm1, %v1637_v14 }
 0x582   : > { %v1639_v31 = vpop.f32.mrf.mxu3 }
 0x583   : > { %v1640_v46 = vadd.f32 %v1960_v43, %v1639_v31 }
 0x585   : > { %1655 = vst.msk [vmem:[%s197_s17 + $0x20] sm:$0xff] %vm216_vm1, %v1640_v46 }
 0x58a   : > { %v1642_v30 = vpop.f32.mrf.mxu3 }
 0x58b   : > { %v1643_v29 = vadd.f32 %v1960_v43, %v1642_v30 }
 0x58d   : > { %1656 = vst.msk [vmem:[%s197_s17 + $0x28] sm:$0xff] %vm216_vm1, %v1643_v29 }
 0x592   : > { %v1645_v12 = vpop.f32.mrf.mxu3 }
 0x593   : > { %v1646_v59 = vadd.f32 %v1960_v43, %v1645_v12 }
 0x595   : > { %1657 = vst.msk [vmem:[%s197_s17 + $0x30] sm:$0xff] %vm216_vm1, %v1646_v59 }
 0x5b5   : > { %v1648_v9 = vpop.f32.mrf.mxu3 }
 0x5b6   : > { %v1649_v19 = vadd.f32 %v1960_v43, %v1648_v9 }
 0x5b8   : > { %1658 = vst.msk [vmem:[%s197_s17 + $0x38] sm:$0xff] %vm216_vm1, %v1649_v19 }
 0x5b9 PF: > { %s14_s15 = sadd.s32 1, %s2095_s15  }
 0x5ba   : > { %p11_p4 = scmp.ge.s32.totalorder %s14_s15, 4  }
 0x5bc   :  { %13 = sbr.rel (!%p11_p4) target bundleno = 1 (0x1), region = 67 }

</bundles_post_ra>
